<compile_context>
chip_gen: v7x
topology: tpu7x:2x2x1
jax: 0.10.0
libtpu: 0.0.40
codegen_flags: <defaults>
</compile_context>

<pallas_src>
import jax
import jax.numpy as jnp
from jax.experimental import pallas as pl
from jax.experimental.pallas import tpu as pltpu

LATENT = 64            # input_size of the Generator
H1, H2, H3 = 128, 256, 512
OUT = 28 * 28          # 784
OUT_PAD = 896          # 7 * 128 -> lane-dense padded output width
BN_EPS = 0.8
LEAK = 0.2


def _leaky_relu(x):
    return jnp.where(x > 0, x, LEAK * x)


def _batchnorm(h, gamma, beta):
    # Training-mode BN with biased batch variance, single-pass statistics.
    mu = jnp.mean(h, axis=0, keepdims=True)
    var = jnp.mean(h * h, axis=0, keepdims=True) - mu * mu
    return (h - mu) * jax.lax.rsqrt(var + BN_EPS) * gamma + beta


def generator_kernel(z_ref,
                     w1_ref, b1_ref,
                     w2_ref, g2_ref, be2_ref,
                     w3_ref, g3_ref, be3_ref,
                     w4_ref, b4_ref,
                     out_ref):
    x = z_ref[...]                                                     # (B, Z)

    # Linear(Z -> 128) + LeakyReLU(0.2)
    h = jnp.dot(x, w1_ref[...], preferred_element_type=jnp.float32) + b1_ref[...]
    h = _leaky_relu(h)

    # Linear(128 -> 256) [bias dropped: cancelled by BN mean-subtract]
    # + BatchNorm1d(256, eps=0.8) + LeakyReLU(0.2)
    h = jnp.dot(h, w2_ref[...], preferred_element_type=jnp.float32)
    h = _leaky_relu(_batchnorm(h, g2_ref[...], be2_ref[...]))

    # Linear(256 -> 512) in bf16 [bias dropped, cancelled by BN]
    # + BatchNorm1d(512, eps=0.8) + LeakyReLU(0.2)
    h = jnp.dot(h.astype(jnp.bfloat16), w3_ref[...],
                preferred_element_type=jnp.float32)
    h = _leaky_relu(_batchnorm(h, g3_ref[...], be3_ref[...]))

    # Linear(512 -> 896 padded; real cols = 784) in bf16 + Tanh
    h = jnp.dot(h.astype(jnp.bfloat16), w4_ref[...],
                preferred_element_type=jnp.float32) + b4_ref[...]
    out_ref[...] = jnp.tanh(h)                                         # (B, 896)


def init_params(key):
    """PyTorch-style init U(-1/sqrt(fan_in), 1/sqrt(fan_in)).

    Weights are stored (in_features, out_features).  w3/w4 are bf16 (HBM
    bandwidth), w4/b4 are zero-padded to OUT_PAD columns, b2/b3 are omitted
    (mathematically cancelled by training-mode BatchNorm).
    """
    def linear(key, fan_in, fan_out, with_bias=True, w_dtype=jnp.float32,
               pad_to=None):
        kw, kb = jax.random.split(key)
        bound = 1.0 / jnp.sqrt(fan_in)
        w = jax.random.uniform(kw, (fan_in, fan_out), jnp.float32, -bound, bound)
        b = jax.random.uniform(kb, (1, fan_out), jnp.float32, -bound, bound)
        if pad_to is not None:
            w = jnp.pad(w, ((0, 0), (0, pad_to - fan_out)))
            b = jnp.pad(b, ((0, 0), (0, pad_to - fan_out)))
        w = w.astype(w_dtype)
        if with_bias:
            return w, b
        return (w,)

    k1, k2, k3, k4 = jax.random.split(key, 4)
    w1, b1 = linear(k1, LATENT, H1)
    (w2,) = linear(k2, H1, H2, with_bias=False)                  # bias cancelled by BN
    (w3,) = linear(k3, H2, H3, with_bias=False, w_dtype=jnp.bfloat16)
    w4, b4 = linear(k4, H3, OUT, w_dtype=jnp.bfloat16, pad_to=OUT_PAD)
    # BatchNorm affine params: gamma=1, beta=0 (PyTorch default init)
    g2, be2 = jnp.ones((1, H2), jnp.float32), jnp.zeros((1, H2), jnp.float32)
    g3, be3 = jnp.ones((1, H3), jnp.float32), jnp.zeros((1, H3), jnp.float32)
    return (w1, b1, w2, g2, be2, w3, g3, be3, w4, b4)


def generator_forward(z, params):
    B = z.shape[0]
    vmem = pl.BlockSpec(memory_space=pltpu.MemorySpace.VMEM)
    flat = pl.pallas_call(
        generator_kernel,
        out_shape=jax.ShapeDtypeStruct((B, OUT_PAD), jnp.float32),
        in_specs=[vmem] * (1 + len(params)),
        out_specs=vmem,
        compiler_params=pltpu.CompilerParams(vmem_limit_bytes=16 << 20),
    )(z, *params)
    # Drop lane padding, then x.view(-1, 1, 28, 28) — NCHW, same as PyTorch.
    return flat[:, :OUT].reshape(B, 1, 28, 28)


def generator_ref(z, params):
    """Pure-JAX reference following the identical numeric path."""
    (w1, b1, w2, g2, be2, w3, g3, be3, w4, b4) = params
    h = jnp.dot(z, w1) + b1
    h = jnp.where(h > 0, h, LEAK * h)

    h = jnp.dot(h, w2)
    mu = h.mean(0, keepdims=True)
    var = (h * h).mean(0, keepdims=True) - mu * mu
    h = (h - mu) * jax.lax.rsqrt(var + BN_EPS) * g2 + be2
    h = jnp.where(h > 0, h, LEAK * h)

    h = jnp.dot(h.astype(jnp.bfloat16), w3,
                preferred_element_type=jnp.float32)
    mu = h.mean(0, keepdims=True)
    var = (h * h).mean(0, keepdims=True) - mu * mu
    h = (h - mu) * jax.lax.rsqrt(var + BN_EPS) * g3 + be3
    h = jnp.where(h > 0, h, LEAK * h)

    h = jnp.tanh(jnp.dot(h.astype(jnp.bfloat16), w4,
                         preferred_element_type=jnp.float32) + b4)
    return h[:, :OUT].reshape(-1, 1, 28, 28)


if __name__ == "__main__":
    key = jax.random.PRNGKey(0)
    kp, kz = jax.random.split(key)
    params = init_params(kp)

    B = 8  # small demo batch; must be >1 for BatchNorm batch statistics
    z = jax.random.normal(kz, (B, LATENT), dtype=jnp.float32)

    out = generator_forward(z, params)
    out = jax.block_until_ready(out)

    ref = generator_ref(z, params)
    assert out.shape == (B, 1, 28, 28)
    assert jnp.allclose(out, ref, atol=1e-3, rtol=1e-3), (
        float(jnp.max(jnp.abs(out - ref))))

    print("KERNEL_OK")
</pallas_src>

<mosaic_0001>
module attributes {stable_mosaic.version = 11 : i64} {
  func.func @generator_kernel(%arg0: memref<8x64xf32, #tpu.memory_space<vmem>>, %arg1: memref<64x128xf32, #tpu.memory_space<vmem>>, %arg2: memref<1x128xf32, #tpu.memory_space<vmem>>, %arg3: memref<128x256xf32, #tpu.memory_space<vmem>>, %arg4: memref<1x256xf32, #tpu.memory_space<vmem>>, %arg5: memref<1x256xf32, #tpu.memory_space<vmem>>, %arg6: memref<256x512xbf16, #tpu.memory_space<vmem>>, %arg7: memref<1x512xf32, #tpu.memory_space<vmem>>, %arg8: memref<1x512xf32, #tpu.memory_space<vmem>>, %arg9: memref<512x896xbf16, #tpu.memory_space<vmem>>, %arg10: memref<1x896xf32, #tpu.memory_space<vmem>>, %arg11: memref<8x896xf32, #tpu.memory_space<vmem>>) attributes {dimension_semantics = [], scalar_prefetch = 0 : i64, scratch_operands = 0 : i64, tpu.core_type = #tpu.core_type<tc>} {
    %c0 = arith.constant 0 : index
    %c0_0 = arith.constant 0 : index
    %0 = vector.load %arg0[%c0, %c0_0] : memref<8x64xf32, #tpu.memory_space<vmem>>, vector<8x64xf32>
    %c0_1 = arith.constant 0 : index
    %c0_2 = arith.constant 0 : index
    %1 = vector.load %arg1[%c0_1, %c0_2] : memref<64x128xf32, #tpu.memory_space<vmem>>, vector<64x128xf32>
    %cst = arith.constant dense<0.000000e+00> : vector<8x128xf32>
    %2 = tpu.matmul %0, %1, %cst {dimension_numbers = #tpu.dot_dimension_numbers<[1], [0], [0], [1], [0, 0, 1, 1], [], []>} : vector<8x64xf32>, vector<64x128xf32>, vector<8x128xf32> -> vector<8x128xf32>
    %c0_3 = arith.constant 0 : index
    %c0_4 = arith.constant 0 : index
    %3 = vector.load %arg2[%c0_3, %c0_4] : memref<1x128xf32, #tpu.memory_space<vmem>>, vector<1x128xf32>
    %4 = vector.broadcast %3 : vector<1x128xf32> to vector<8x128xf32>
    %5 = arith.addf %2, %4 : vector<8x128xf32>
    %cst_5 = arith.constant 0.000000e+00 : f32
    %6 = vector.broadcast %cst_5 : f32 to vector<8x128xf32>
    %7 = arith.cmpf ogt, %5, %6 : vector<8x128xf32>
    %cst_6 = arith.constant 2.000000e-01 : f32
    %8 = vector.broadcast %cst_6 : f32 to vector<8x128xf32>
    %9 = arith.mulf %8, %5 : vector<8x128xf32>
    %10 = arith.select %7, %5, %9 : vector<8x128xi1>, vector<8x128xf32>
    %c0_7 = arith.constant 0 : index
    %c0_8 = arith.constant 0 : index
    %11 = vector.load %arg3[%c0_7, %c0_8] : memref<128x256xf32, #tpu.memory_space<vmem>>, vector<128x256xf32>
    %cst_9 = arith.constant dense<0.000000e+00> : vector<8x256xf32>
    %12 = tpu.matmul %10, %11, %cst_9 {dimension_numbers = #tpu.dot_dimension_numbers<[1], [0], [0], [1], [0, 0, 1, 1], [], []>} : vector<8x128xf32>, vector<128x256xf32>, vector<8x256xf32> -> vector<8x256xf32>
    %c0_10 = arith.constant 0 : index
    %c0_11 = arith.constant 0 : index
    %13 = vector.load %arg4[%c0_10, %c0_11] : memref<1x256xf32, #tpu.memory_space<vmem>>, vector<1x256xf32>
    %c0_12 = arith.constant 0 : index
    %c0_13 = arith.constant 0 : index
    %14 = vector.load %arg5[%c0_12, %c0_13] : memref<1x256xf32, #tpu.memory_space<vmem>>, vector<1x256xf32>
    %cst_14 = arith.constant dense<0.000000e+00> : vector<256xf32>
    %15 = vector.multi_reduction <add>, %12, %cst_14 [0] : vector<8x256xf32> to vector<256xf32>
    %16 = vector.shape_cast %15 : vector<256xf32> to vector<1x256xf32>
    %cst_15 = arith.constant 8.000000e+00 : f32
    %17 = vector.broadcast %cst_15 : f32 to vector<1x256xf32>
    %18 = arith.divf %16, %17 : vector<1x256xf32>
    %19 = arith.mulf %12, %12 : vector<8x256xf32>
    %cst_16 = arith.constant dense<0.000000e+00> : vector<256xf32>
    %20 = vector.multi_reduction <add>, %19, %cst_16 [0] : vector<8x256xf32> to vector<256xf32>
    %21 = vector.shape_cast %20 : vector<256xf32> to vector<1x256xf32>
    %cst_17 = arith.constant 8.000000e+00 : f32
    %22 = vector.broadcast %cst_17 : f32 to vector<1x256xf32>
    %23 = arith.divf %21, %22 : vector<1x256xf32>
    %24 = arith.mulf %18, %18 : vector<1x256xf32>
    %25 = arith.subf %23, %24 : vector<1x256xf32>
    %26 = vector.broadcast %18 : vector<1x256xf32> to vector<8x256xf32>
    %27 = arith.subf %12, %26 : vector<8x256xf32>
    %cst_18 = arith.constant 8.000000e-01 : f32
    %28 = vector.broadcast %cst_18 : f32 to vector<1x256xf32>
    %29 = arith.addf %25, %28 : vector<1x256xf32>
    %30 = math.rsqrt %29 : vector<1x256xf32>
    %31 = vector.broadcast %30 : vector<1x256xf32> to vector<8x256xf32>
    %32 = arith.mulf %27, %31 : vector<8x256xf32>
    %33 = vector.broadcast %13 : vector<1x256xf32> to vector<8x256xf32>
    %34 = arith.mulf %32, %33 : vector<8x256xf32>
    %35 = vector.broadcast %14 : vector<1x256xf32> to vector<8x256xf32>
    %36 = arith.addf %34, %35 : vector<8x256xf32>
    %cst_19 = arith.constant 0.000000e+00 : f32
    %37 = vector.broadcast %cst_19 : f32 to vector<8x256xf32>
    %38 = arith.cmpf ogt, %36, %37 : vector<8x256xf32>
    %cst_20 = arith.constant 2.000000e-01 : f32
    %39 = vector.broadcast %cst_20 : f32 to vector<8x256xf32>
    %40 = arith.mulf %39, %36 : vector<8x256xf32>
    %41 = arith.select %38, %36, %40 : vector<8x256xi1>, vector<8x256xf32>
    %42 = arith.truncf %41 : vector<8x256xf32> to vector<8x256xbf16>
    %c0_21 = arith.constant 0 : index
    %c0_22 = arith.constant 0 : index
    %43 = vector.load %arg6[%c0_21, %c0_22] : memref<256x512xbf16, #tpu.memory_space<vmem>>, vector<256x512xbf16>
    %cst_23 = arith.constant dense<0.000000e+00> : vector<8x512xf32>
    %44 = tpu.matmul %42, %43, %cst_23 {dimension_numbers = #tpu.dot_dimension_numbers<[1], [0], [0], [1], [0, 0, 1, 1], [], []>} : vector<8x256xbf16>, vector<256x512xbf16>, vector<8x512xf32> -> vector<8x512xf32>
    %c0_24 = arith.constant 0 : index
    %c0_25 = arith.constant 0 : index
    %45 = vector.load %arg7[%c0_24, %c0_25] : memref<1x512xf32, #tpu.memory_space<vmem>>, vector<1x512xf32>
    %c0_26 = arith.constant 0 : index
    %c0_27 = arith.constant 0 : index
    %46 = vector.load %arg8[%c0_26, %c0_27] : memref<1x512xf32, #tpu.memory_space<vmem>>, vector<1x512xf32>
    %cst_28 = arith.constant dense<0.000000e+00> : vector<512xf32>
    %47 = vector.multi_reduction <add>, %44, %cst_28 [0] : vector<8x512xf32> to vector<512xf32>
    %48 = vector.shape_cast %47 : vector<512xf32> to vector<1x512xf32>
    %cst_29 = arith.constant 8.000000e+00 : f32
    %49 = vector.broadcast %cst_29 : f32 to vector<1x512xf32>
    %50 = arith.divf %48, %49 : vector<1x512xf32>
    %51 = arith.mulf %44, %44 : vector<8x512xf32>
    %cst_30 = arith.constant dense<0.000000e+00> : vector<512xf32>
    %52 = vector.multi_reduction <add>, %51, %cst_30 [0] : vector<8x512xf32> to vector<512xf32>
    %53 = vector.shape_cast %52 : vector<512xf32> to vector<1x512xf32>
    %cst_31 = arith.constant 8.000000e+00 : f32
    %54 = vector.broadcast %cst_31 : f32 to vector<1x512xf32>
    %55 = arith.divf %53, %54 : vector<1x512xf32>
    %56 = arith.mulf %50, %50 : vector<1x512xf32>
    %57 = arith.subf %55, %56 : vector<1x512xf32>
    %58 = vector.broadcast %50 : vector<1x512xf32> to vector<8x512xf32>
    %59 = arith.subf %44, %58 : vector<8x512xf32>
    %cst_32 = arith.constant 8.000000e-01 : f32
    %60 = vector.broadcast %cst_32 : f32 to vector<1x512xf32>
    %61 = arith.addf %57, %60 : vector<1x512xf32>
    %62 = math.rsqrt %61 : vector<1x512xf32>
    %63 = vector.broadcast %62 : vector<1x512xf32> to vector<8x512xf32>
    %64 = arith.mulf %59, %63 : vector<8x512xf32>
    %65 = vector.broadcast %45 : vector<1x512xf32> to vector<8x512xf32>
    %66 = arith.mulf %64, %65 : vector<8x512xf32>
    %67 = vector.broadcast %46 : vector<1x512xf32> to vector<8x512xf32>
    %68 = arith.addf %66, %67 : vector<8x512xf32>
    %cst_33 = arith.constant 0.000000e+00 : f32
    %69 = vector.broadcast %cst_33 : f32 to vector<8x512xf32>
    %70 = arith.cmpf ogt, %68, %69 : vector<8x512xf32>
    %cst_34 = arith.constant 2.000000e-01 : f32
    %71 = vector.broadcast %cst_34 : f32 to vector<8x512xf32>
    %72 = arith.mulf %71, %68 : vector<8x512xf32>
    %73 = arith.select %70, %68, %72 : vector<8x512xi1>, vector<8x512xf32>
    %74 = arith.truncf %73 : vector<8x512xf32> to vector<8x512xbf16>
    %c0_35 = arith.constant 0 : index
    %c0_36 = arith.constant 0 : index
    %75 = vector.load %arg9[%c0_35, %c0_36] : memref<512x896xbf16, #tpu.memory_space<vmem>>, vector<512x896xbf16>
    %cst_37 = arith.constant dense<0.000000e+00> : vector<8x896xf32>
    %76 = tpu.matmul %74, %75, %cst_37 {dimension_numbers = #tpu.dot_dimension_numbers<[1], [0], [0], [1], [0, 0, 1, 1], [], []>} : vector<8x512xbf16>, vector<512x896xbf16>, vector<8x896xf32> -> vector<8x896xf32>
    %c0_38 = arith.constant 0 : index
    %c0_39 = arith.constant 0 : index
    %77 = vector.load %arg10[%c0_38, %c0_39] : memref<1x896xf32, #tpu.memory_space<vmem>>, vector<1x896xf32>
    %78 = vector.broadcast %77 : vector<1x896xf32> to vector<8x896xf32>
    %79 = arith.addf %76, %78 : vector<8x896xf32>
    %80 = math.tanh %79 : vector<8x896xf32>
    %c0_40 = arith.constant 0 : index
    %c0_41 = arith.constant 0 : index
    %81 = vector.load %arg11[%c0_40, %c0_41] : memref<8x896xf32, #tpu.memory_space<vmem>>, vector<8x896xf32>
    tpu.vector_store %arg11[%c0_40, %c0_41], %80 {strides = array<i32>} : memref<8x896xf32, #tpu.memory_space<vmem>>, vector<8x896xf32>,
    return
  }
}

</mosaic_0001>

<bundles_post_ra>
// kernel: tpu_custom_call.1
= control target key start
LH: loop header
LB: loop body
LE: loop exit
PB: predicated region body
PF: predicated region fallthrough
CT: control target
= control target key end

     0   :  { %16 = vsyncpa [#allocation3], 0  ;;  %s4169_s0 = inlined_call_operand.hbm [shape: f32[8,64], index: 0, kind: input, shape index: {}]   ;;  %s4170_s1 = inlined_call_operand.hbm [shape: f32[64,128], index: 1, kind: input, shape index: {}]   ;;  %s4171_s2 = inlined_call_operand.hbm [shape: f32[1,128], index: 2, kind: input, shape index: {}]   ;;  %s4172_s3 = inlined_call_operand.hbm [shape: f32[128,256], index: 3, kind: input, shape index: {}]   ;;  %s4173_s4 = inlined_call_operand.hbm [shape: f32[1,256], index: 4, kind: input, shape index: {}]   ;;  %s4174_s5 = inlined_call_operand.vmem [shape: f32[1,256], index: 5, kind: input, shape index: {}]   ;;  %s4175_s6 = inlined_call_operand.hbm [shape: bf16[256,512], index: 6, kind: input, shape index: {}]   ;;  %s4176_s7 = inlined_call_operand.vmem [shape: f32[1,512], index: 7, kind: input, shape index: {}]   ;;  %s4177_s8 = inlined_call_operand.vmem [shape: f32[1,512], index: 8, kind: input, shape index: {}]   ;;  %s4178_s9 = inlined_call_operand.hbm [shape: bf16[512,896], index: 9, kind: input, shape index: {}]   ;;  %s4179_s10 = inlined_call_operand.vmem [shape: f32[1,896], index: 10, kind: input, shape index: {}]   ;;  %s4180_s11 = inlined_call_operand.hbm [shape: f32[8,896], index: 11, kind: output, shape index: {}]  }
   0x1   :  { %17 = vsyncpa [#allocation6], 0 }
   0x2   :  { %18 = vsyncpa [#allocation9], 0 }
   0x3   :  { %19 = vsyncpa [#allocation12], 0 }
   0x4   :  { %20 = vsyncpa [#allocation4], 0  ;;  %s3894_s17 = smov [#allocation5]   ;;  %s3708_s21 = scalar_lea.hbm %s4170_s1, 1024 }
   0x5   :  { %s36_s18 = sshll.u32 %s3894_s17, 4  ;;  %p3709_p0 = scmp.ne.s32.totalorder %s4170_s1, %s3708_s21  ;;  %s37_s18 = int_to_ptr.vmem [resolvable:$true] %s36_s18 }
   0x6   :  { %p3712_p1 = scmp.lt.u32.totalorder %s3708_s21, %s4170_s1 }
   0x8   :  { %p3714_p2 = pnand %p3712_p1, %p3709_p0 }
   0xa   :  { %3717 = shalt.err (!%p3714_p2)
}
   0xb   :  { %s3718_s26 = scalar_lea.vmem %s37_s18, 1024  ;;  %p3723_p4 = scmp.lt.s32.totalorder %s37_s18, %s37_s18 }
   0xc   :  { %p3719_p3 = scmp.ne.s32.totalorder %s37_s18, %s3718_s26  ;;  %p3724_p5 = scmp.lt.s32.totalorder %s3718_s26, %s3718_s26 }
   0xe   :  { %p3725_p6 = por %p3724_p5, %p3723_p4 }
  0x10   :  { %p3726_p7 = pnand %p3725_p6, %p3719_p3 }
  0x12   :  { %3729 = shalt.err (!%p3726_p7)
}
  0x13   :  { %s3895_s27 = smov 128   ;;  %s3896_s28 = smov 8  }
  0x14   :  { %42 = dma.hbm_to_vmem [thread:$0]  %s4170_s1, 1024, %s37_s18, [#allocation6], %s3895_s27, %s3895_s27, %s3896_s28  }
  0x15   :  { %s3897_s12 = smov [#allocation8]   ;;  %s3730_s16 = scalar_lea.hbm %s4172_s3, 4096 }
  0x16   :  { %s58_s13 = sshll.u32 %s3897_s12, 4  ;;  %p3731_p8 = scmp.ne.s32.totalorder %s4172_s3, %s3730_s16  ;;  %s59_s13 = int_to_ptr.vmem [resolvable:$true] %s58_s13 }
  0x17   :  { %p3734_p9 = scmp.lt.u32.totalorder %s3730_s16, %s4172_s3 }
  0x19   :  { %p3736_p10 = pnand %p3734_p9, %p3731_p8 }
  0x1b   :  { %3739 = shalt.err (!%p3736_p10)
}
  0x1c   :  { %s3740_s22 = scalar_lea.vmem %s59_s13, 4096  ;;  %p3745_p12 = scmp.lt.s32.totalorder %s59_s13, %s59_s13 }
  0x1d   :  { %p3741_p11 = scmp.ne.s32.totalorder %s59_s13, %s3740_s22  ;;  %p3746_p13 = scmp.lt.s32.totalorder %s3740_s22, %s3740_s22 }
  0x1f   :  { %p3747_p0 = por %p3746_p13, %p3745_p12 }
  0x21   :  { %p3748_p1 = pnand %p3747_p0, %p3741_p11 }
  0x23   :  { %3751 = shalt.err (!%p3748_p1)
}
  0x24   :  { %s3898_s1 = smov 256   ;;  %s3899_s18 = smov 16  }
  0x25   :  { %64 = dma.hbm_to_vmem [thread:$0]  %s4172_s3, 4096, %s59_s13, [#allocation9], %s3898_s1, %s3898_s1, %s3899_s18  }
  0x26   :  { %s3900_s25 = smov [#allocation11]   ;;  %s3901_s27 = smov [#allocation2]  }
  0x27   :  { %s82_s26 = sshll.u32 %s3900_s25, 4  ;;  %s27_s28 = sshll.u32 %s3901_s27, 4  ;;  %s83_s26 = int_to_ptr.vmem [resolvable:$true] %s82_s26  ;;  %s28_s28 = int_to_ptr.vmem [resolvable:$true] %s27_s28 }
  0x28   :  { %s3752_s12 = scalar_lea.hbm %s4175_s6, 8192 }
  0x29   :  { %p3753_p2 = scmp.ne.s32.totalorder %s4175_s6, %s3752_s12  ;;  %p3756_p3 = scmp.lt.u32.totalorder %s3752_s12, %s4175_s6 }
  0x2b   :  { %p3758_p4 = pnand %p3756_p3, %p3753_p2 }
  0x2d   :  { %3761 = shalt.err (!%p3758_p4)
}
  0x2e   :  { %s3762_s3 = scalar_lea.vmem %s83_s26, 8192  ;;  %p3767_p6 = scmp.lt.s32.totalorder %s83_s26, %s83_s26 }
  0x2f   :  { %p3763_p5 = scmp.ne.s32.totalorder %s83_s26, %s3762_s3  ;;  %p3768_p7 = scmp.lt.s32.totalorder %s3762_s3, %s3762_s3 }
  0x31   :  { %p3769_p8 = por %p3768_p7, %p3767_p6 }
  0x33   :  { %p3770_p9 = pnand %p3769_p8, %p3763_p5 }
  0x35   :  { %3773 = shalt.err (!%p3770_p9)
}
  0x36   :  { %88 = dma.hbm_to_vmem [thread:$0]  %s4175_s6, 8192, %s83_s26, [#allocation12], %s3898_s1, %s3898_s1, %s3899_s18  }
  0x37   :  { %s3774_s22 = scalar_lea.hbm %s4169_s0, 128 }
  0x38   :  { %p3775_p10 = scmp.ne.s32.totalorder %s4169_s0, %s3774_s22  ;;  %p3778_p11 = scmp.lt.u32.totalorder %s3774_s22, %s4169_s0 }
  0x3a   :  { %p3780_p12 = pnand %p3778_p11, %p3775_p10 }
  0x3c   :  { %3783 = shalt.err (!%p3780_p12)
}
  0x3d   :  { %s3784_s29 = scalar_lea.vmem %s28_s28, 128  ;;  %p3789_p0 = scmp.lt.s32.totalorder %s28_s28, %s28_s28 }
  0x3e   :  { %p3785_p13 = scmp.ne.s32.totalorder %s28_s28, %s3784_s29  ;;  %p3790_p1 = scmp.lt.s32.totalorder %s3784_s29, %s3784_s29 }
  0x40   :  { %p3791_p2 = por %p3790_p1, %p3789_p0 }
  0x42   :  { %p3792_p3 = pnand %p3791_p2, %p3785_p13 }
  0x44   :  { %3795 = shalt.err (!%p3792_p3)
}
  0x45   :  { %30 = dma.hbm_to_vmem [thread:$0]  %s4169_s0, 128, %s28_s28, [#allocation3]  }
  0x46   :  { %s3902_s18 = smov [#allocation7]   ;;  %s3903_s30 = smov [#allocation10]  }
  0x47   :  { %s49_s26 = sshll.u32 %s3902_s18, 4  ;;  %s71_s12 = sshll.u32 %s3903_s30, 4  ;;  %s50_s26 = int_to_ptr.vmem [resolvable:$true] %s49_s26  ;;  %s72_s12 = int_to_ptr.vmem [resolvable:$true] %s71_s12 }
  0x48   :  { %s3796_s16 = scalar_lea.hbm %s4171_s2, 16 }
  0x49   :  { %p3797_p4 = scmp.ne.s32.totalorder %s4171_s2, %s3796_s16  ;;  %p3800_p5 = scmp.lt.u32.totalorder %s3796_s16, %s4171_s2 }
  0x4b   :  { %p3802_p6 = pnand %p3800_p5, %p3797_p4 }
  0x4d   :  { %3805 = shalt.err (!%p3802_p6)
}
  0x4e   :  { %s3806_s0 = scalar_lea.vmem %s50_s26, 16  ;;  %s3810_s28 = scalar_lea.vmem %s50_s26, 32 }
  0x4f   :  { %p3807_p7 = scmp.ne.s32.totalorder %s50_s26, %s3806_s0  ;;  %p3811_p8 = scmp.lt.s32.totalorder %s50_s26, %s50_s26 }
  0x50   :  { %p3812_p9 = scmp.lt.s32.totalorder %s3810_s28, %s3806_s0 }
  0x52   :  { %p3813_p10 = por %p3812_p9, %p3811_p8 }
  0x54   :  { %p3814_p11 = pnand %p3813_p10, %p3807_p7 }
  0x56   :  { %3817 = shalt.err (!%p3814_p11)
}
  0x57   :  { %52 = dma.hbm_to_vmem [thread:$0]  %s4171_s2, 16, %s50_s26, [#allocation6]  }
  0x58   :  { %s3818_s24 = scalar_lea.hbm %s4173_s4, 32 }
  0x59   :  { %p3819_p12 = scmp.ne.s32.totalorder %s4173_s4, %s3818_s24  ;;  %p3822_p13 = scmp.lt.u32.totalorder %s3818_s24, %s4173_s4 }
  0x5b   :  { %p3824_p0 = pnand %p3822_p13, %p3819_p12 }
  0x5d   :  { %3827 = shalt.err (!%p3824_p0)
}
  0x5e   :  { %s3828_s1 = scalar_lea.vmem %s72_s12, 32  ;;  %p3833_p2 = scmp.lt.s32.totalorder %s72_s12, %s72_s12 }
  0x5f   :  { %p3829_p1 = scmp.ne.s32.totalorder %s72_s12, %s3828_s1  ;;  %p3834_p3 = scmp.lt.s32.totalorder %s3828_s1, %s3828_s1 }
  0x61   :  { %p3835_p4 = por %p3834_p3, %p3833_p2 }
  0x63   :  { %p3836_p5 = pnand %p3835_p4, %p3829_p1 }
  0x65   :  { %3839 = shalt.err (!%p3836_p5)
}
  0x66   :  { %74 = dma.hbm_to_vmem [thread:$0]  %s4173_s4, 32, %s72_s12, [#allocation9]  }
  0x67   :  { %s3904_s26 = smov [#allocation13]   ;;  %s3840_s16 = scalar_lea.hbm %s4178_s9, 28672 }
  0x68   :  { %s98_s30 = sshll.u32 %s3904_s26, 4  ;;  %p3841_p6 = scmp.ne.s32.totalorder %s4178_s9, %s3840_s16  ;;  %s99_s30 = int_to_ptr.vmem [resolvable:$true] %s98_s30 }
  0x69   :  { %p3844_p7 = scmp.lt.u32.totalorder %s3840_s16, %s4178_s9 }
  0x6b   :  { %p3846_p8 = pnand %p3844_p7, %p3841_p6 }
  0x6d   :  { %3849 = shalt.err (!%p3846_p8)
}
  0x6e   :  { %s3850_s0 = scalar_lea.vmem %s99_s30, 28672  ;;  %p3855_p10 = scmp.lt.s32.totalorder %s99_s30, %s99_s30 }
  0x6f   :  { %p3851_p9 = scmp.ne.s32.totalorder %s99_s30, %s3850_s0  ;;  %p3856_p11 = scmp.lt.s32.totalorder %s3850_s0, %s3850_s0 }
  0x71   :  { %p3857_p12 = por %p3856_p11, %p3855_p10 }
  0x73   :  { %p3858_p13 = pnand %p3857_p12, %p3851_p9 }
  0x75   :  { %3861 = shalt.err (!%p3858_p13)
}
  0x76   :  { %s3905_s4 = smov 448   ;;  %s3906_s12 = smov 28  }
  0x77   :  { %104 = dma.hbm_to_vmem [thread:$0]  %s4178_s9, 28672, %s99_s30, [#allocation12], %s3905_s4, %s3905_s4, %s3906_s12  }
  0x78   :  { %3884 = dma.done.wait [#allocation3], 128  }
  0x79   :  { %3885 = vsyncadd [#allocation3], 4294967168 }
  0x7a   :  { %3886 = dma.done.wait [#allocation6], 1040  }
  0x7b   :  { %3887 = vsyncadd [#allocation6], 4294966256 }
  0x7c   :  { %3888 = dma.done.wait [#allocation9], 4128  }
  0x7d   :  { %3889 = vsyncadd [#allocation9], 4294963168 }
  0x7e   :  { %3890 = dma.done.wait [#allocation12], 36864  }
  0x7f   :  { %3891 = vsyncadd [#allocation12], 4294930432  ;;  %v3907_v0 = vmov 0.0|0.0   ;;  %vm3908_vm0 = vmmov 0   ;;  %v3909_v1 = vmov 0.0   ;;  %v130_v2 = vld [vmem:[#allocation5] sm:$0xff] }
  0x80   :  { %3187 = vmatprep.subr.bf16.mxu1 %v3907_v0  ;;  %3184 = vmatprep.mubr.msk.f32.mxu1 %vm3908_vm0, %v3909_v1  ;;  %v131_v3 = vld [vmem:[#allocation5 + $0x8] sm:$0xff]  ;;  %v132_v4 = vld [vmem:[#allocation5 + $0x10] sm:$0xff]  ;;  %v133_v6 = vld [vmem:[#allocation5 + $0x18] sm:$0xff]  ;;  %vm145_vm1 = vcmask 523264  }
  0x81   :  { %v3188_v5 = vpack.c.bf16 %v131_v3, %v130_v2  ;;  %v3191_v7 = vpack.c.bf16 %v133_v6, %v132_v4  ;;  %v134_v8 = vld [vmem:[#allocation5 + $0x20] sm:$0xff]  ;;  %v135_v9 = vld [vmem:[#allocation5 + $0x28] sm:$0xff]  ;;  %v136_v11 = vld [vmem:[#allocation5 + $0x30] sm:$0xff] }
  0x82   :  { %v3194_v10 = vpack.c.bf16 %v135_v9, %v134_v8  ;;  %v137_v12 = vld [vmem:[#allocation5 + $0x38] sm:$0xff]  ;;  %v223_v13 = vld [vmem:[#allocation8 + $0x8] sm:$0xff]  ;;  %v222_v16 = vld [vmem:[#allocation8] sm:$0xff] }
  0x83   :  { %3189 = vmatpush3.bf16.msra.mxu1 %v3188_v5  ;;  %v225_v14 = vld [vmem:[#allocation8 + $0x18] sm:$0xff]  ;;  %v3197_v15 = vpack.c.bf16 %v137_v12, %v136_v11  ;;  %v224_v17 = vld [vmem:[#allocation8 + $0x10] sm:$0xff]  ;;  %v227_v19 = vld [vmem:[#allocation8 + $0x28] sm:$0xff] }
  0x84   :  { %3190 = vmatprep.subr.bf16.mxu1 %v3907_v0  ;;  %v3199_v18 = vpack.c.bf16 %v225_v14, %v223_v13  ;;  %v229_v20 = vld [vmem:[#allocation8 + $0x38] sm:$0xff]  ;;  %v226_v22 = vld [vmem:[#allocation8 + $0x20] sm:$0xff]  ;;  %v228_v23 = vld [vmem:[#allocation8 + $0x30] sm:$0xff]  ;;  %v3201_v24 = vpack.c.bf16 %v224_v17, %v222_v16 }
  0x85   :  { %v129_v21 = vld [vmem:[#allocation2] sm:$0xff]  ;;  %v231_v25 = vld [vmem:[#allocation8 + $0x48] sm:$0xff]  ;;  %v3203_v27 = vpack.c.bf16 %v229_v20, %v227_v19  ;;  %v230_v28 = vld [vmem:[#allocation8 + $0x40] sm:$0xff]  ;;  %v3205_v30 = vpack.c.bf16 %v228_v23, %v226_v22 }
  0x86   :  { %v233_v26 = vld [vmem:[#allocation8 + $0x58] sm:$0xff]  ;;  %v232_v29 = vld [vmem:[#allocation8 + $0x50] sm:$0xff]  ;;  %v235_v31 = vld [vmem:[#allocation8 + $0x68] sm:$0xff] }
  0x87   :  { %3192 = vmatpush3.bf16.msra.mxu1 %v3191_v7  ;;  %v237_v32 = vld [vmem:[#allocation8 + $0x78] sm:$0xff]  ;;  %v3207_v33 = vpack.c.bf16 %v233_v26, %v231_v25  ;;  %v234_v34 = vld [vmem:[#allocation8 + $0x60] sm:$0xff]  ;;  %v236_v35 = vld [vmem:[#allocation8 + $0x70] sm:$0xff]  ;;  %v3209_v36 = vpack.c.bf16 %v232_v29, %v230_v28 }
  0x88   :  { %3193 = vmatprep.subr.bf16.mxu1 %v3907_v0  ;;  %v239_v37 = vld [vmem:[#allocation8 + $0x88] sm:$0xff]  ;;  %v241_v38 = vld [vmem:[#allocation8 + $0x98] sm:$0xff]  ;;  %v3211_v39 = vpack.c.bf16 %v237_v32, %v235_v31  ;;  %v238_v40 = vld [vmem:[#allocation8 + $0x80] sm:$0xff]  ;;  %v3213_v42 = vpack.c.bf16 %v236_v35, %v234_v34 }
  0x89   :  { %v240_v41 = vld [vmem:[#allocation8 + $0x90] sm:$0xff]  ;;  %v243_v43 = vld [vmem:[#allocation8 + $0xa8] sm:$0xff]  ;;  %v245_v44 = vld [vmem:[#allocation8 + $0xb8] sm:$0xff]  ;;  %v3215_v45 = vpack.c.bf16 %v241_v38, %v239_v37 }
  0x8a   :  { %v242_v46 = vld [vmem:[#allocation8 + $0xa0] sm:$0xff]  ;;  %v244_v47 = vld [vmem:[#allocation8 + $0xb0] sm:$0xff]  ;;  %v3217_v48 = vpack.c.bf16 %v240_v41, %v238_v40  ;;  %v247_v49 = vld [vmem:[#allocation8 + $0xc8] sm:$0xff]  ;;  %v3219_v51 = vpack.c.bf16 %v245_v44, %v243_v43 }
  0x8b   :  { %3195 = vmatpush3.bf16.msra.mxu1 %v3194_v10  ;;  %v249_v50 = vld [vmem:[#allocation8 + $0xd8] sm:$0xff]  ;;  %v246_v52 = vld [vmem:[#allocation8 + $0xc0] sm:$0xff]  ;;  %v248_v53 = vld [vmem:[#allocation8 + $0xd0] sm:$0xff]  ;;  %v3221_v54 = vpack.c.bf16 %v244_v47, %v242_v46 }
  0x8c   :  { %3196 = vmatprep.subr.bf16.mxu1 %v3907_v0  ;;  %v3223_v55 = vpack.c.bf16 %v249_v50, %v247_v49  ;;  %v3225_v56 = vpack.c.bf16 %v248_v53, %v246_v52  ;;  %v251_v57 = vld [vmem:[#allocation8 + $0xe8] sm:$0xff]  ;;  %v253_v58 = vld [vmem:[#allocation8 + $0xf8] sm:$0xff]  ;;  %v250_v60 = vld [vmem:[#allocation8 + $0xe0] sm:$0xff] }
  0x8d   :  { %v3227_v59 = vpack.c.bf16 %v253_v58, %v251_v57  ;;  %v252_v61 = vld [vmem:[#allocation8 + $0xf0] sm:$0xff]  ;;  %v2825_v10 = vld [vmem:[#allocation7] ss:$0 sm:$0xff]  ;;  %v3280_v20 = vld [vmem:[#allocation11 + $0x48] ss:$16 sps:$4 sm:$0xff]  }
  0x8e   :  { %v3229_v62 = vpack.c.bf16 %v252_v61, %v250_v60  ;;  %v3266_v63 = vld [vmem:[#allocation11 + $0x4] ss:$16 sps:$4 sm:$0xff]   ;;  %v3270_v0 = vld [vmem:[#allocation11 + $0xc] ss:$16 sps:$4 sm:$0xff]   ;;  %v3277_v3 = vld [vmem:[#allocation11 + $0x20] ss:$16 sps:$4 sm:$0xff]  }
  0x8f   :  { %3198 = vmatpush3.bf16.msra.mxu1 %v3197_v15  ;;  %v3272_v2 = vld [vmem:[#allocation11 + $0x24] ss:$16 sps:$4 sm:$0xff]   ;;  %788 = vmatprep.subr.bf16.mxu0 %v3266_v63  ;;  %v3283_v5 = vld [vmem:[#allocation11 + $0x40] ss:$16 sps:$4 sm:$0xff]   ;;  %v3268_v15 = vld [vmem:[#allocation11 + $0x8] ss:$16 sps:$4 sm:$0xff]  }
  0x90   :  { %3200 = vmatprep.subr.bf16.mxu1 %v3199_v18  ;;  %v3278_v4 = vld [vmem:[#allocation11 + $0x44] ss:$16 sps:$4 sm:$0xff]   ;;  %v3289_v7 = vld [vmem:[#allocation11 + $0x60] ss:$16 sps:$4 sm:$0xff]   ;;  %v3276_v16 = vld [vmem:[#allocation11 + $0x2c] ss:$16 sps:$4 sm:$0xff]  }
  0x91   :  { %v3284_v6 = vld [vmem:[#allocation11 + $0x64] ss:$16 sps:$4 sm:$0xff]   ;;  %v3295_v9 = vld [vmem:[#allocation11 + $0x80] ss:$16 sps:$4 sm:$0xff]   ;;  %v3274_v18 = vld [vmem:[#allocation11 + $0x28] ss:$16 sps:$4 sm:$0xff]  }
  0x92   :  { %3185 = vmatmul.mubr.msk.f32.vlgmr.msra.gmra.mrb[0].mxu1 %vm145_vm1, %v129_v21  ;;  %v3290_v8 = vld [vmem:[#allocation11 + $0x84] ss:$16 sps:$4 sm:$0xff]   ;;  %v3282_v19 = vld [vmem:[#allocation11 + $0x4c] ss:$16 sps:$4 sm:$0xff]   ;;  %v3286_v22 = vld [vmem:[#allocation11 + $0x68] ss:$16 sps:$4 sm:$0xff]  }
  0x93   :  { %3202 = vmatpush1.bf16.msra.mxu1 %v3201_v24  ;;  %318 = vmatprep.mubr.f32.mxu1 %v3909_v1  ;;  %v3271_v1 = vld [vmem:[#allocation11] ss:$16 sps:$4 sm:$0xff]   ;;  %v3288_v21 = vld [vmem:[#allocation11 + $0x6c] ss:$16 sps:$4 sm:$0xff]   ;;  %v3292_v24 = vld [vmem:[#allocation11 + $0x88] ss:$16 sps:$4 sm:$0xff]  }
  0x94   :  { %3204 = vmatprep.subr.bf16.mxu1 %v3203_v27  ;;  %789 = vmatpush1.bf16.msra.mxu0 %v3271_v1  ;;  %v3294_v23 = vld [vmem:[#allocation11 + $0x8c] ss:$16 sps:$4 sm:$0xff]   ;;  %v3296_v25 = vld [vmem:[#allocation11 + $0xa4] ss:$16 sps:$4 sm:$0xff]   ;;  %v3298_v27 = vld [vmem:[#allocation11 + $0xa8] ss:$16 sps:$4 sm:$0xff]  }
  0x95   :  { %790 = vmatprep.subr.bf16.mxu0 %v3272_v2  ;;  %v3300_v26 = vld [vmem:[#allocation11 + $0xac] ss:$16 sps:$4 sm:$0xff]   ;;  %v3301_v28 = vld [vmem:[#allocation11 + $0xa0] ss:$16 sps:$4 sm:$0xff]   ;;  %v3302_v29 = vld [vmem:[#allocation11 + $0xc4] ss:$16 sps:$4 sm:$0xff]  }
  0x96   :  { %v3304_v31 = vld [vmem:[#allocation11 + $0xc8] ss:$16 sps:$4 sm:$0xff]   ;;  %v3307_v32 = vld [vmem:[#allocation11 + $0xc0] ss:$16 sps:$4 sm:$0xff]   ;;  %v3312_v34 = vld [vmem:[#allocation11 + $0xec] ss:$16 sps:$4 sm:$0xff]  }
  0x97   :  { %3206 = vmatpush1.bf16.msra.mxu1 %v3205_v30  ;;  %v3306_v30 = vld [vmem:[#allocation11 + $0xcc] ss:$16 sps:$4 sm:$0xff]   ;;  %v3310_v35 = vld [vmem:[#allocation11 + $0xe8] ss:$16 sps:$4 sm:$0xff]   ;;  %v3314_v37 = vld [vmem:[#allocation11 + $0x104] ss:$16 sps:$4 sm:$0xff]  }
  0x98   :  { %3208 = vmatprep.subr.bf16.mxu1 %v3207_v33  ;;  %791 = vmatpush1.bf16.msra.mxu0 %v3277_v3  ;;  %v3308_v33 = vld [vmem:[#allocation11 + $0xe4] ss:$16 sps:$4 sm:$0xff]   ;;  %v3318_v38 = vld [vmem:[#allocation11 + $0x10c] ss:$16 sps:$4 sm:$0xff]   ;;  %v3319_v40 = vld [vmem:[#allocation11 + $0x100] ss:$16 sps:$4 sm:$0xff]  }
  0x99   :  { %792 = vmatprep.subr.bf16.mxu0 %v3278_v4  ;;  %v3320_v41 = vld [vmem:[#allocation11 + $0x124] ss:$16 sps:$4 sm:$0xff]   ;;  %v3322_v43 = vld [vmem:[#allocation11 + $0x128] ss:$16 sps:$4 sm:$0xff]   ;;  %v3325_v44 = vld [vmem:[#allocation11 + $0x120] ss:$16 sps:$4 sm:$0xff]  }
  0x9a   :  { %v3330_v46 = vld [vmem:[#allocation11 + $0x14c] ss:$16 sps:$4 sm:$0xff]   ;;  %v3328_v47 = vld [vmem:[#allocation11 + $0x148] ss:$16 sps:$4 sm:$0xff]   ;;  %v3332_v49 = vld [vmem:[#allocation11 + $0x164] ss:$16 sps:$4 sm:$0xff]  }
  0x9b   :  { %3210 = vmatpush1.bf16.msra.mxu1 %v3209_v36  ;;  %v3313_v36 = vld [vmem:[#allocation11 + $0xe0] ss:$16 sps:$4 sm:$0xff]   ;;  %v3336_v50 = vld [vmem:[#allocation11 + $0x16c] ss:$16 sps:$4 sm:$0xff]   ;;  %v3338_v53 = vld [vmem:[#allocation11 + $0x184] ss:$16 sps:$4 sm:$0xff]  }
  0x9c   :  { %3212 = vmatprep.subr.bf16.mxu1 %v3211_v39  ;;  %793 = vmatpush1.bf16.msra.mxu0 %v3283_v5  ;;  %v3316_v39 = vld [vmem:[#allocation11 + $0x108] ss:$16 sps:$4 sm:$0xff]   ;;  %v3337_v52 = vld [vmem:[#allocation11 + $0x160] ss:$16 sps:$4 sm:$0xff]   ;;  %v3344_v57 = vld [vmem:[#allocation11 + $0x1a4] ss:$16 sps:$4 sm:$0xff]  }
  0x9d   :  { %794 = vmatprep.subr.bf16.mxu0 %v3284_v6  ;;  %v3348_v58 = vld [vmem:[#allocation11 + $0x1ac] ss:$16 sps:$4 sm:$0xff]   ;;  %v3349_v60 = vld [vmem:[#allocation11 + $0x1a0] ss:$16 sps:$4 sm:$0xff]   ;;  %v3350_v61 = vld [vmem:[#allocation11 + $0x1c4] ss:$16 sps:$4 sm:$0xff]  }
  0x9e   :  { %v3354_v63 = vld [vmem:[#allocation11 + $0x1cc] ss:$16 sps:$4 sm:$0xff]   ;;  %v3356_v1 = vld [vmem:[#allocation11 + $0x1e4] ss:$16 sps:$4 sm:$0xff]   ;;  %v3358_v3 = vld [vmem:[#allocation11 + $0x1e8] ss:$16 sps:$4 sm:$0xff]  }
  0x9f   :  { %3214 = vmatpush1.bf16.msra.mxu1 %v3213_v42  ;;  %v3324_v42 = vld [vmem:[#allocation11 + $0x12c] ss:$16 sps:$4 sm:$0xff]   ;;  %v3361_v4 = vld [vmem:[#allocation11 + $0x1e0] ss:$16 sps:$4 sm:$0xff]  }
  0xa0   :  { %3216 = vmatprep.subr.bf16.mxu1 %v3215_v45  ;;  %795 = vmatpush1.bf16.msra.mxu0 %v3289_v7  ;;  %v3326_v45 = vld [vmem:[#allocation11 + $0x144] ss:$16 sps:$4 sm:$0xff]   ;;  %v3360_v2 = vld [vmem:[#allocation11 + $0x1ec] ss:$16 sps:$4 sm:$0xff]  }
  0xa1   :  { %796 = vmatprep.subr.bf16.mxu0 %v3290_v8  ;;  %v3364_v5 = vld [vmem:[#allocation13 + $0x4] ss:$28 sps:$4 sm:$0xff]   ;;  %v3367_v6 = vld [vmem:[#allocation13 + $0xc] ss:$28 sps:$4 sm:$0xff]  }
  0xa3   :  { %3218 = vmatpush1.bf16.msra.mxu1 %v3217_v48  ;;  %v3331_v48 = vld [vmem:[#allocation11 + $0x140] ss:$16 sps:$4 sm:$0xff]  }
  0xa4   :  { %3220 = vmatprep.subr.bf16.mxu1 %v3219_v51  ;;  %797 = vmatpush1.bf16.msra.mxu0 %v3295_v9  ;;  %v3334_v51 = vld [vmem:[#allocation11 + $0x168] ss:$16 sps:$4 sm:$0xff]  }
  0xa5   :  { %798 = vmatprep.subr.bf16.mxu0 %v3296_v25 }
  0xa7   :  { %3222 = vmatpush1.bf16.msra.mxu1 %v3221_v54  ;;  %v3342_v54 = vld [vmem:[#allocation11 + $0x18c] ss:$16 sps:$4 sm:$0xff]  }
  0xa8   :  { %3224 = vmatprep.subr.bf16.mxu1 %v3223_v55  ;;  %799 = vmatpush1.bf16.msra.mxu0 %v3301_v28  ;;  %v3340_v55 = vld [vmem:[#allocation11 + $0x188] ss:$16 sps:$4 sm:$0xff]  }
  0xa9   :  { %800 = vmatprep.subr.bf16.mxu0 %v3302_v29 }
  0xab   :  { %3226 = vmatpush1.bf16.msra.mxu1 %v3225_v56  ;;  %v3343_v56 = vld [vmem:[#allocation11 + $0x180] ss:$16 sps:$4 sm:$0xff]  }
  0xac   :  { %3228 = vmatprep.subr.bf16.mxu1 %v3227_v59  ;;  %801 = vmatpush1.bf16.msra.mxu0 %v3307_v32  ;;  %v3346_v59 = vld [vmem:[#allocation11 + $0x1a8] ss:$16 sps:$4 sm:$0xff]  }
  0xad   :  { %802 = vmatprep.subr.bf16.mxu0 %v3308_v33 }
  0xaf   :  { %3230 = vmatpush1.bf16.msra.mxu1 %v3229_v62  ;;  %v3352_v62 = vld [vmem:[#allocation11 + $0x1c8] ss:$16 sps:$4 sm:$0xff]  }
  0xb0   :  { %829 = vmatprep.subr.bf16.mxu1 %v3270_v0  ;;  %803 = vmatpush1.bf16.msra.mxu0 %v3313_v36  ;;  %v3355_v0 = vld [vmem:[#allocation11 + $0x1c0] ss:$16 sps:$4 sm:$0xff]  }
  0xb1   :  { %804 = vmatprep.subr.bf16.mxu0 %v3314_v37 }
  0xb4   :  { %805 = vmatpush1.bf16.msra.mxu0 %v3319_v40 }
  0xb5   :  { %806 = vmatprep.subr.bf16.mxu0 %v3320_v41 }
  0xb8   :  { %807 = vmatpush1.bf16.msra.mxu0 %v3325_v44 }
  0xb9   :  { %808 = vmatprep.subr.bf16.mxu0 %v3326_v45 }
  0xbc   :  { %809 = vmatpush1.bf16.msra.mxu0 %v3331_v48  ;;  %v325_v48 = vld [vmem:[#allocation10] sm:$0x3] }
  0xbd   :  { %810 = vmatprep.subr.bf16.mxu0 %v3332_v49 }
  0xc0   :  { %811 = vmatpush1.bf16.msra.mxu0 %v3337_v52 }
  0xc1   :  { %812 = vmatprep.subr.bf16.mxu0 %v3338_v53 }
  0xc4   :  { %813 = vmatpush1.bf16.msra.mxu0 %v3343_v56 }
  0xc5   :  { %814 = vmatprep.subr.bf16.mxu0 %v3344_v57 }
  0xc8   :  { %815 = vmatpush1.bf16.msra.mxu0 %v3349_v60 }
  0xc9   :  { %816 = vmatprep.subr.bf16.mxu0 %v3350_v61 }
  0xcc   :  { %817 = vmatpush1.bf16.msra.mxu0 %v3355_v0 }
  0xcd   :  { %818 = vmatprep.subr.bf16.mxu0 %v3356_v1 }
  0xd0   :  { %819 = vmatpush1.bf16.msra.mxu0 %v3361_v4 }
  0xd1   :  { %2467 = vmatprep.subr.bf16.mxu0 %v3364_v5 }
 0x165   :  { %v215_v11 = vpop.f32.mrb[0].mxu1 }
 0x166   :  { %v216_v12 = vadd.f32 %v2825_v10, %v215_v11  ;;  %v3186_v13 = vpop.f32.mrb[1].mxu1 }
 0x168   :  { %vm219_vm2 = vcmp.gt.f32.partialorder %v216_v12, 0.0  ;;  %v220_v14 = vmul.f32 0.2, %v216_v12 }
 0x16a   :  { %v221_v17 = vsel %vm219_vm2, %v216_v12, %v220_v14 }
 0x16b   :  { %319 = vmatmul.mubr.f32.vlgmr.msra.gmra.mrb[2].mxu1 %v221_v17 }
 0x16c   :  { %830 = vmatpush1.bf16.msra.mxu1 %v3268_v15 }
 0x16d   :  { %831 = vmatprep.subr.bf16.mxu1 %v3276_v16 }
 0x170   :  { %832 = vmatpush1.bf16.msra.mxu1 %v3274_v18 }
 0x171   :  { %833 = vmatprep.subr.bf16.mxu1 %v3282_v19 }
 0x174   :  { %834 = vmatpush1.bf16.msra.mxu1 %v3280_v20 }
 0x175   :  { %835 = vmatprep.subr.bf16.mxu1 %v3288_v21 }
 0x178   :  { %836 = vmatpush1.bf16.msra.mxu1 %v3286_v22 }
 0x179   :  { %837 = vmatprep.subr.bf16.mxu1 %v3294_v23 }
 0x17c   :  { %838 = vmatpush1.bf16.msra.mxu1 %v3292_v24 }
 0x17d   :  { %839 = vmatprep.subr.bf16.mxu1 %v3300_v26 }
 0x180   :  { %840 = vmatpush1.bf16.msra.mxu1 %v3298_v27 }
 0x181   :  { %841 = vmatprep.subr.bf16.mxu1 %v3306_v30 }
 0x184   :  { %842 = vmatpush1.bf16.msra.mxu1 %v3304_v31 }
 0x185   :  { %843 = vmatprep.subr.bf16.mxu1 %v3312_v34 }
 0x188   :  { %844 = vmatpush1.bf16.msra.mxu1 %v3310_v35 }
 0x189   :  { %845 = vmatprep.subr.bf16.mxu1 %v3318_v38 }
 0x18c   :  { %846 = vmatpush1.bf16.msra.mxu1 %v3316_v39 }
 0x18d   :  { %847 = vmatprep.subr.bf16.mxu1 %v3324_v42  ;;  %v371_v42 = vlaneseq }
 0x190   :  { %848 = vmatpush1.bf16.msra.mxu1 %v3322_v43 }
 0x191   :  { %849 = vmatprep.subr.bf16.mxu1 %v3330_v46  ;;  %v4055_v46 = vshrl.u32 %v371_v42, 7  ;;  %v3421_v42 = vld [vmem:[#allocation13 + $0x204] ss:$28 sps:$4 sm:$0xff]  }
 0x193   :  { %v4061_v49 = vsub.s32 1, %v4055_v46 }
 0x194   :  { %850 = vmatpush1.bf16.msra.mxu1 %v3328_v47  ;;  %v4058_v47 = vsub.s32 0, %v4055_v46 }
 0x195   :  { %851 = vmatprep.subr.bf16.mxu1 %v3336_v50  ;;  %v326_v50 = vld [vmem:[%s4174_s5] sm:$0x3] }
 0x196   :  { %v374_v52 = vrot.slane %v325_v48, %v4058_v47  ;;  %v391_v60 = vrot.slane %v326_v50, %v4061_v49 }
 0x198   :  { %852 = vmatpush1.bf16.msra.mxu1 %v3334_v51 }
 0x199   :  { %853 = vmatprep.subr.bf16.mxu1 %v3342_v54 }
 0x19c   :  { %854 = vmatpush1.bf16.msra.mxu1 %v3340_v55  ;;  %v378_v55 = vrot.slane %v325_v48, %v4061_v49  ;;  %v3427_v48 = vld [vmem:[#allocation13 + $0x23c] ss:$28 sps:$4 sm:$0xff]  }
 0x19d   :  { %855 = vmatprep.subr.bf16.mxu1 %v3348_v58  ;;  %v387_v58 = vrot.slane %v326_v50, %v4058_v47  ;;  %v3422_v50 = vld [vmem:[#allocation13 + $0x230] ss:$28 sps:$4 sm:$0xff]  }
 0x1a0   :  { %856 = vmatpush1.bf16.msra.mxu1 %v3346_v59 }
 0x1a1   :  { %857 = vmatprep.subr.bf16.mxu1 %v3354_v63 }
 0x1a4   :  { %858 = vmatpush1.bf16.msra.mxu1 %v3352_v62 }
 0x1a5   :  { %859 = vmatprep.subr.bf16.mxu1 %v3360_v2 }
 0x1a8   :  { %860 = vmatpush1.bf16.msra.mxu1 %v3358_v3 }
 0x1a9   :  { %2549 = vmatprep.subr.bf16.mxu1 %v3367_v6  ;;  %v3362_v6 = vld [vmem:[#allocation13] ss:$28 sps:$4 sm:$0xff]  }
 0x23e   :  { %v320_v7 = vpop.f32.mrb[2].mxu1 }
 0x23f   :  { %v327_v8 = vrot.slane %v320_v7, 4  ;;  %v342_v9 = vmul.f32 %v320_v7, %v320_v7  ;;  %v322_v10 = vpop.f32.mrb[3].mxu1 }
 0x240   :  { %v333_v11 = vrot.slane %v322_v10, 4  ;;  %v343_v12 = vmul.f32 %v322_v10, %v322_v10 }
 0x241   :  { %v328_v13 = vadd.f32 %v327_v8, %v320_v7  ;;  %v344_v14 = vrot.slane %v342_v9, 4 }
 0x242   :  { %v334_v15 = vadd.f32 %v333_v11, %v322_v10  ;;  %v350_v16 = vrot.slane %v343_v12, 4  ;;  %v3368_v11 = vld [vmem:[#allocation13 + $0x38] ss:$28 sps:$4 sm:$0xff]  }
 0x243   :  { %v329_v17 = vrot.slane %v328_v13, 2  ;;  %v345_v18 = vadd.f32 %v344_v14, %v342_v9  ;;  %v3370_v9 = vld [vmem:[#allocation13 + $0x3c] ss:$28 sps:$4 sm:$0xff]  }
 0x244   :  { %v335_v19 = vrot.slane %v334_v15, 2  ;;  %v351_v20 = vadd.f32 %v350_v16, %v343_v12  ;;  %v3371_v12 = vld [vmem:[#allocation13 + $0x40] ss:$28 sps:$4 sm:$0xff]   ;;  %v3377_v16 = vld [vmem:[#allocation13 + $0x78] ss:$28 sps:$4 sm:$0xff]  }
 0x245   :  { %v330_v21 = vadd.f32 %v329_v17, %v328_v13  ;;  %v346_v22 = vrot.slane %v345_v18, 2  ;;  %v3376_v13 = vld [vmem:[#allocation13 + $0x74] ss:$28 sps:$4 sm:$0xff]   ;;  %v3379_v14 = vld [vmem:[#allocation13 + $0x7c] ss:$28 sps:$4 sm:$0xff]  }
 0x246   :  { %v336_v23 = vadd.f32 %v335_v19, %v334_v15  ;;  %v352_v24 = vrot.slane %v351_v20, 2  ;;  %v3374_v15 = vld [vmem:[#allocation13 + $0x70] ss:$28 sps:$4 sm:$0xff]   ;;  %v3380_v19 = vld [vmem:[#allocation13 + $0xa8] ss:$28 sps:$4 sm:$0xff]  }
 0x247   :  { %v331_v25 = vrot.slane %v330_v21, 1  ;;  %v347_v26 = vadd.f32 %v346_v22, %v345_v18  ;;  %v3382_v17 = vld [vmem:[#allocation13 + $0xac] ss:$28 sps:$4 sm:$0xff]   ;;  %v3385_v18 = vld [vmem:[#allocation13 + $0xb4] ss:$28 sps:$4 sm:$0xff]  }
 0x248   :  { %v337_v27 = vrot.slane %v336_v23, 1  ;;  %v353_v28 = vadd.f32 %v352_v24, %v351_v20  ;;  %v3383_v20 = vld [vmem:[#allocation13 + $0xb0] ss:$28 sps:$4 sm:$0xff]   ;;  %v3389_v24 = vld [vmem:[#allocation13 + $0xe8] ss:$28 sps:$4 sm:$0xff]  }
 0x249   :  { %v332_v29 = vadd.f32 %v331_v25, %v330_v21  ;;  %v348_v30 = vrot.slane %v347_v26, 1  ;;  %v3388_v21 = vld [vmem:[#allocation13 + $0xe4] ss:$28 sps:$4 sm:$0xff]   ;;  %v3391_v22 = vld [vmem:[#allocation13 + $0xec] ss:$28 sps:$4 sm:$0xff]  }
 0x24a   :  { %v338_v31 = vadd.f32 %v337_v27, %v336_v23  ;;  %v354_v32 = vrot.slane %v353_v28, 1  ;;  %v3386_v23 = vld [vmem:[#allocation13 + $0xe0] ss:$28 sps:$4 sm:$0xff]   ;;  %v3392_v27 = vld [vmem:[#allocation13 + $0x118] ss:$28 sps:$4 sm:$0xff]  }
 0x24b   :  { %v340_v33 = vmul.f32 0.125, %v332_v29  ;;  %v349_v34 = vadd.f32 %v348_v30, %v347_v26  ;;  %v3394_v25 = vld [vmem:[#allocation13 + $0x11c] ss:$28 sps:$4 sm:$0xff]   ;;  %v3397_v26 = vld [vmem:[#allocation13 + $0x124] ss:$28 sps:$4 sm:$0xff]  }
 0x24c   :  { %v341_v35 = vmul.f32 0.125, %v338_v31  ;;  %v355_v36 = vadd.f32 %v354_v32, %v353_v28  ;;  %v3395_v28 = vld [vmem:[#allocation13 + $0x120] ss:$28 sps:$4 sm:$0xff]   ;;  %v3400_v29 = vld [vmem:[#allocation13 + $0x154] ss:$28 sps:$4 sm:$0xff]  }
 0x24d   :  { %v356_v37 = vmul.f32 0.125, %v349_v34  ;;  %v358_v38 = vmul.f32 %v340_v33, %v340_v33  ;;  %v362_v51 = vsub.f32 %v320_v7, %v340_v33  ;;  %v3365_v7 = vld [vmem:[#allocation13 + $0x8] ss:$28 sps:$4 sm:$0xff]   ;;  %v3403_v30 = vld [vmem:[#allocation13 + $0x15c] ss:$28 sps:$4 sm:$0xff]  }
 0x24e   :  { %v357_v39 = vmul.f32 0.125, %v355_v36  ;;  %v359_v40 = vmul.f32 %v341_v35, %v341_v35  ;;  %v363_v54 = vsub.f32 %v322_v10, %v341_v35  ;;  %v3373_v10 = vld [vmem:[#allocation13 + $0x44] ss:$28 sps:$4 sm:$0xff]   ;;  %v3398_v31 = vld [vmem:[#allocation13 + $0x150] ss:$28 sps:$4 sm:$0xff]  }
 0x24f   :  { %v360_v41 = vsub.f32 %v356_v37, %v358_v38  ;;  %v3401_v32 = vld [vmem:[#allocation13 + $0x158] ss:$28 sps:$4 sm:$0xff]   ;;  %v3406_v33 = vld [vmem:[#allocation13 + $0x18c] ss:$28 sps:$4 sm:$0xff]   ;;  %v3412_v37 = vld [vmem:[#allocation13 + $0x1c4] ss:$28 sps:$4 sm:$0xff]  }
 0x250   :  { %v361_v43 = vsub.f32 %v357_v39, %v359_v40  ;;  %v3409_v34 = vld [vmem:[#allocation13 + $0x194] ss:$28 sps:$4 sm:$0xff]   ;;  %v3404_v35 = vld [vmem:[#allocation13 + $0x188] ss:$28 sps:$4 sm:$0xff]   ;;  %v3410_v39 = vld [vmem:[#allocation13 + $0x1c0] ss:$28 sps:$4 sm:$0xff]  }
 0x251   :  { %v364_v44 = vadd.f32 0.8, %v360_v41  ;;  %v3407_v36 = vld [vmem:[#allocation13 + $0x190] ss:$28 sps:$4 sm:$0xff]   ;;  %v3413_v40 = vld [vmem:[#allocation13 + $0x1c8] ss:$28 sps:$4 sm:$0xff]  }
 0x252   :  { %v365_v45 = vadd.f32 0.8, %v361_v43  ;;  %v3415_v38 = vld [vmem:[#allocation13 + $0x1cc] ss:$28 sps:$4 sm:$0xff]   ;;  %v3418_v41 = vld [vmem:[#allocation13 + $0x1fc] ss:$28 sps:$4 sm:$0xff]  }
 0x253   :  { %3682 = vrsqrt.f32 %v364_v44  ;;  %v3416_v43 = vld [vmem:[#allocation13 + $0x1f8] ss:$28 sps:$4 sm:$0xff]   ;;  %v3419_v44 = vld [vmem:[#allocation13 + $0x200] ss:$28 sps:$4 sm:$0xff]  }
 0x254   :  { %3684 = vrsqrt.f32 %v365_v45  ;;  %v3424_v45 = vld [vmem:[#allocation13 + $0x234] ss:$28 sps:$4 sm:$0xff]  }
 0x25d   :  { %v3683_v53 = vpop.eup %3682 }
 0x25e   :  { %v3685_v56 = vpop.eup %3684  ;;  %v368_v57 = vmul.f32 %v3683_v53, %v362_v51  ;;  %v3425_v51 = vld [vmem:[#allocation13 + $0x238] ss:$28 sps:$4 sm:$0xff]  }
 0x25f   :  { %v369_v59 = vmul.f32 %v3685_v56, %v363_v54  ;;  %v3433_v53 = vld [vmem:[#allocation13 + $0x274] ss:$28 sps:$4 sm:$0xff]   ;;  %v3428_v54 = vld [vmem:[#allocation13 + $0x268] ss:$28 sps:$4 sm:$0xff]  }
 0x260   :  { %v381_v61 = vmul.f32 %v374_v52, %v368_v57  ;;  %v3430_v52 = vld [vmem:[#allocation13 + $0x26c] ss:$28 sps:$4 sm:$0xff]   ;;  %v3436_v56 = vld [vmem:[#allocation13 + $0x2a4] ss:$28 sps:$4 sm:$0xff]  }
 0x261   :  { %v382_v62 = vmul.f32 %v378_v55, %v369_v59  ;;  %v3431_v55 = vld [vmem:[#allocation13 + $0x270] ss:$28 sps:$4 sm:$0xff]   ;;  %v3437_v59 = vld [vmem:[#allocation13 + $0x2a8] ss:$28 sps:$4 sm:$0xff]  }
 0x262   :  { %v394_v63 = vadd.f32 %v387_v58, %v381_v61  ;;  %v3439_v57 = vld [vmem:[#allocation13 + $0x2ac] ss:$28 sps:$4 sm:$0xff]   ;;  %v3434_v58 = vld [vmem:[#allocation13 + $0x2a0] ss:$28 sps:$4 sm:$0xff]  }
 0x263   :  { %v395_v0 = vadd.f32 %v391_v60, %v382_v62  ;;  %v3442_v60 = vld [vmem:[#allocation13 + $0x2dc] ss:$28 sps:$4 sm:$0xff]   ;;  %v3445_v61 = vld [vmem:[#allocation13 + $0x2e4] ss:$28 sps:$4 sm:$0xff]  }
 0x264   :  { %vm396_vm3 = vcmp.gt.f32.partialorder %v394_v63, 0.0  ;;  %v398_v1 = vmul.f32 0.2, %v394_v63  ;;  %v3440_v62 = vld [vmem:[#allocation13 + $0x2d8] ss:$28 sps:$4 sm:$0xff]  }
 0x265   :  { %vm397_vm4 = vcmp.gt.f32.partialorder %v395_v0, 0.0  ;;  %v399_v2 = vmul.f32 0.2, %v395_v0 }
 0x266   :  { %v400_v3 = vsel %vm396_vm3, %v394_v63, %v398_v1  ;;  %v3443_v63 = vld [vmem:[#allocation13 + $0x2e0] ss:$28 sps:$4 sm:$0xff]  }
 0x267   :  { %v401_v4 = vsel %vm397_vm4, %v395_v0, %v399_v2  ;;  %v402_v8 = vpack.c.bf16 %v400_v3, %v400_v3  ;;  %v3448_v0 = vld [vmem:[#allocation13 + $0x314] ss:$28 sps:$4 sm:$0xff]   ;;  %v3451_v1 = vld [vmem:[#allocation13 + $0x31c] ss:$28 sps:$4 sm:$0xff]  }
 0x268   :  { %v403_v5 = vpack.c.bf16 %v401_v4, %v401_v4  ;;  %v3446_v2 = vld [vmem:[#allocation13 + $0x310] ss:$28 sps:$4 sm:$0xff]   ;;  %v3449_v3 = vld [vmem:[#allocation13 + $0x318] ss:$28 sps:$4 sm:$0xff]   ;;  %v3452_v4 = vld [vmem:[#allocation13 + $0x348] ss:$28 sps:$4 sm:$0xff]  }
 0x26a   :  { %820 = vmatprep.mubr.bf16.mxu0 %v403_v5  ;;  %861 = vmatprep.mubr.bf16.mxu1 %v403_v5  ;;  %v3454_v5 = vld [vmem:[#allocation13 + $0x34c] ss:$28 sps:$4 sm:$0xff]  }
 0x26b   :  { %821 = vmatmul.mubr.bf16.vlgmr.msra.gmra.mrb[0].mxu0 %v402_v8  ;;  %862 = vmatmul.mubr.bf16.vlgmr.msra.gmra.mrb[4].mxu1 %v402_v8  ;;  %v3460_v8 = vld [vmem:[#allocation13 + $0x384] ss:$28 sps:$4 sm:$0xff]  }
 0x26c   :  { %2468 = vmatpush1.bf16.msra.mxu0 %v3362_v6  ;;  %2550 = vmatpush1.bf16.msra.mxu1 %v3365_v7  ;;  %v3455_v6 = vld [vmem:[#allocation13 + $0x350] ss:$28 sps:$4 sm:$0xff]  }
 0x26d   :  { %2469 = vmatprep.subr.bf16.mxu0 %v3370_v9  ;;  %2551 = vmatprep.subr.bf16.mxu1 %v3373_v10  ;;  %v3457_v7 = vld [vmem:[#allocation13 + $0x354] ss:$28 sps:$4 sm:$0xff]   ;;  %v3463_v9 = vld [vmem:[#allocation13 + $0x38c] ss:$28 sps:$4 sm:$0xff]  }
 0x270   :  { %2470 = vmatpush1.bf16.msra.mxu0 %v3368_v11  ;;  %2552 = vmatpush1.bf16.msra.mxu1 %v3371_v12 }
 0x271   :  { %2471 = vmatprep.subr.bf16.mxu0 %v3376_v13  ;;  %2553 = vmatprep.subr.bf16.mxu1 %v3379_v14 }
 0x274   :  { %2472 = vmatpush1.bf16.msra.mxu0 %v3374_v15  ;;  %2554 = vmatpush1.bf16.msra.mxu1 %v3377_v16 }
 0x275   :  { %2473 = vmatprep.subr.bf16.mxu0 %v3382_v17  ;;  %2555 = vmatprep.subr.bf16.mxu1 %v3385_v18 }
 0x278   :  { %2474 = vmatpush1.bf16.msra.mxu0 %v3380_v19  ;;  %2556 = vmatpush1.bf16.msra.mxu1 %v3383_v20 }
 0x279   :  { %2475 = vmatprep.subr.bf16.mxu0 %v3388_v21  ;;  %2557 = vmatprep.subr.bf16.mxu1 %v3391_v22 }
 0x27c   :  { %2476 = vmatpush1.bf16.msra.mxu0 %v3386_v23  ;;  %2558 = vmatpush1.bf16.msra.mxu1 %v3389_v24 }
 0x27d   :  { %2477 = vmatprep.subr.bf16.mxu0 %v3394_v25  ;;  %2559 = vmatprep.subr.bf16.mxu1 %v3397_v26 }
 0x280   :  { %2478 = vmatpush1.bf16.msra.mxu0 %v3392_v27  ;;  %2560 = vmatpush1.bf16.msra.mxu1 %v3395_v28 }
 0x281   :  { %2479 = vmatprep.subr.bf16.mxu0 %v3400_v29  ;;  %2561 = vmatprep.subr.bf16.mxu1 %v3403_v30 }
 0x284   :  { %2480 = vmatpush1.bf16.msra.mxu0 %v3398_v31  ;;  %2562 = vmatpush1.bf16.msra.mxu1 %v3401_v32 }
 0x285   :  { %2481 = vmatprep.subr.bf16.mxu0 %v3406_v33  ;;  %2563 = vmatprep.subr.bf16.mxu1 %v3409_v34 }
 0x288   :  { %2482 = vmatpush1.bf16.msra.mxu0 %v3404_v35  ;;  %2564 = vmatpush1.bf16.msra.mxu1 %v3407_v36 }
 0x289   :  { %2483 = vmatprep.subr.bf16.mxu0 %v3412_v37  ;;  %2565 = vmatprep.subr.bf16.mxu1 %v3415_v38 }
 0x28c   :  { %2484 = vmatpush1.bf16.msra.mxu0 %v3410_v39  ;;  %2566 = vmatpush1.bf16.msra.mxu1 %v3413_v40 }
 0x28d   :  { %2485 = vmatprep.subr.bf16.mxu0 %v3418_v41  ;;  %2567 = vmatprep.subr.bf16.mxu1 %v3421_v42 }
 0x290   :  { %2486 = vmatpush1.bf16.msra.mxu0 %v3416_v43  ;;  %2568 = vmatpush1.bf16.msra.mxu1 %v3419_v44 }
 0x291   :  { %2487 = vmatprep.subr.bf16.mxu0 %v3424_v45  ;;  %2569 = vmatprep.subr.bf16.mxu1 %v3427_v48 }
 0x294   :  { %2488 = vmatpush1.bf16.msra.mxu0 %v3422_v50  ;;  %2570 = vmatpush1.bf16.msra.mxu1 %v3425_v51 }
 0x295   :  { %2489 = vmatprep.subr.bf16.mxu0 %v3430_v52  ;;  %2571 = vmatprep.subr.bf16.mxu1 %v3433_v53 }
 0x298   :  { %2490 = vmatpush1.bf16.msra.mxu0 %v3428_v54  ;;  %2572 = vmatpush1.bf16.msra.mxu1 %v3431_v55 }
 0x299   :  { %2491 = vmatprep.subr.bf16.mxu0 %v3436_v56  ;;  %2573 = vmatprep.subr.bf16.mxu1 %v3439_v57 }
 0x29c   :  { %2492 = vmatpush1.bf16.msra.mxu0 %v3434_v58  ;;  %2574 = vmatpush1.bf16.msra.mxu1 %v3437_v59 }
 0x29d   :  { %2493 = vmatprep.subr.bf16.mxu0 %v3442_v60  ;;  %2575 = vmatprep.subr.bf16.mxu1 %v3445_v61 }
 0x2a0   :  { %2494 = vmatpush1.bf16.msra.mxu0 %v3440_v62  ;;  %2576 = vmatpush1.bf16.msra.mxu1 %v3443_v63 }
 0x2a1   :  { %2495 = vmatprep.subr.bf16.mxu0 %v3448_v0  ;;  %2577 = vmatprep.subr.bf16.mxu1 %v3451_v1 }
 0x2a4   :  { %2496 = vmatpush1.bf16.msra.mxu0 %v3446_v2  ;;  %2578 = vmatpush1.bf16.msra.mxu1 %v3449_v3 }
 0x2a5   :  { %2497 = vmatprep.subr.bf16.mxu0 %v3454_v5  ;;  %2579 = vmatprep.subr.bf16.mxu1 %v3457_v7 }
 0x2a8   :  { %2498 = vmatpush1.bf16.msra.mxu0 %v3452_v4  ;;  %2580 = vmatpush1.bf16.msra.mxu1 %v3455_v6 }
 0x2a9   :  { %2508 = vmatprep.subr.bf16.mxu0 %v3460_v8  ;;  %2590 = vmatprep.subr.bf16.mxu1 %v3463_v9 }
 0x33e   :  { %v4070_v10 = vpop.f32.mrb[0].mxu0  ;;  %v4072_v11 = vpop.f32.mrb[4].mxu1 }
 0x33f   :  { %v872_v12 = vrot.slane %v4070_v10, 4  ;;  %v900_v13 = vmul.f32 %v4070_v10, %v4070_v10  ;;  %v884_v14 = vrot.slane %v4072_v11, 4  ;;  %v902_v15 = vmul.f32 %v4072_v11, %v4072_v11  ;;  %v4080_v16 = vpop.f32.mrb[1].mxu0  ;;  %v4082_v17 = vpop.f32.mrb[5].mxu1 }
 0x340   :  { %v878_v18 = vrot.slane %v4080_v16, 4  ;;  %v901_v19 = vmul.f32 %v4080_v16, %v4080_v16  ;;  %v890_v20 = vrot.slane %v4082_v17, 4  ;;  %v903_v21 = vmul.f32 %v4082_v17, %v4082_v17  ;;  %v826_v22 = vpop.f32.mrb[2].mxu0  ;;  %v867_v23 = vpop.f32.mrb[6].mxu1 }
 0x341   :  { %v873_v24 = vadd.f32 %v872_v12, %v4070_v10  ;;  %v904_v25 = vrot.slane %v900_v13, 4  ;;  %v885_v26 = vadd.f32 %v884_v14, %v4072_v11  ;;  %v916_v27 = vrot.slane %v902_v15, 4  ;;  %v827_v28 = vpop.f32.mrb[3].mxu0  ;;  %v868_v29 = vpop.f32.mrb[7].mxu1 }
 0x342   :  { %v879_v30 = vadd.f32 %v878_v18, %v4080_v16  ;;  %v910_v31 = vrot.slane %v901_v19, 4  ;;  %v891_v32 = vadd.f32 %v890_v20, %v4082_v17  ;;  %v922_v33 = vrot.slane %v903_v21, 4 }
 0x343   :  { %v874_v34 = vrot.slane %v873_v24, 2  ;;  %v905_v35 = vadd.f32 %v904_v25, %v900_v13  ;;  %v886_v36 = vrot.slane %v885_v26, 2  ;;  %v917_v37 = vadd.f32 %v916_v27, %v902_v15 }
 0x344   :  { %v880_v38 = vrot.slane %v879_v30, 2  ;;  %v911_v39 = vadd.f32 %v910_v31, %v901_v19  ;;  %v892_v40 = vrot.slane %v891_v32, 2  ;;  %v923_v41 = vadd.f32 %v922_v33, %v903_v21  ;;  %v870_v33 = vld [vmem:[%s4176_s7] sm:$0xf] }
 0x345   :  { %v875_v42 = vadd.f32 %v874_v34, %v873_v24  ;;  %v906_v43 = vrot.slane %v905_v35, 2  ;;  %v887_v44 = vadd.f32 %v886_v36, %v885_v26  ;;  %v918_v45 = vrot.slane %v917_v37, 2 }
 0x346   :  { %v881_v48 = vadd.f32 %v880_v38, %v879_v30  ;;  %v912_v50 = vrot.slane %v911_v39, 2  ;;  %v893_v51 = vadd.f32 %v892_v40, %v891_v32  ;;  %v924_v52 = vrot.slane %v923_v41, 2 }
 0x347   :  { %v876_v53 = vrot.slane %v875_v42, 1  ;;  %v907_v54 = vadd.f32 %v906_v43, %v905_v35  ;;  %v888_v55 = vrot.slane %v887_v44, 1  ;;  %v919_v56 = vadd.f32 %v918_v45, %v917_v37  ;;  %v871_v35 = vld [vmem:[%s4177_s8] sm:$0xf] }
 0x348   :  { %v882_v57 = vrot.slane %v881_v48, 1  ;;  %v913_v58 = vadd.f32 %v912_v50, %v911_v39  ;;  %v894_v59 = vrot.slane %v893_v51, 1  ;;  %v925_v60 = vadd.f32 %v924_v52, %v923_v41 }
 0x349   :  { %v877_v61 = vadd.f32 %v876_v53, %v875_v42  ;;  %v908_v62 = vrot.slane %v907_v54, 1  ;;  %v889_v63 = vadd.f32 %v888_v55, %v887_v44  ;;  %v920_v0 = vrot.slane %v919_v56, 1 }
 0x34a   :  { %v883_v1 = vadd.f32 %v882_v57, %v881_v48  ;;  %v914_v2 = vrot.slane %v913_v58, 1  ;;  %v895_v3 = vadd.f32 %v894_v59, %v893_v51  ;;  %v926_v4 = vrot.slane %v925_v60, 1 }
 0x34b   :  { %v896_v5 = vmul.f32 0.125, %v877_v61  ;;  %v909_v6 = vadd.f32 %v908_v62, %v907_v54  ;;  %v898_v7 = vmul.f32 0.125, %v889_v63  ;;  %v921_v8 = vadd.f32 %v920_v0, %v919_v56 }
 0x34c   :  { %v897_v9 = vmul.f32 0.125, %v883_v1  ;;  %v915_v12 = vadd.f32 %v914_v2, %v913_v58  ;;  %v899_v13 = vmul.f32 0.125, %v895_v3  ;;  %v927_v14 = vadd.f32 %v926_v4, %v925_v60 }
 0x34d   :  { %v928_v15 = vmul.f32 0.125, %v909_v6  ;;  %v932_v18 = vmul.f32 %v896_v5, %v896_v5  ;;  %v930_v19 = vmul.f32 0.125, %v921_v8  ;;  %v934_v20 = vmul.f32 %v898_v7, %v898_v7  ;;  %v3458_v6 = vld [vmem:[#allocation13 + $0x380] ss:$28 sps:$4 sm:$0xff]  }
 0x34e   :  { %v929_v21 = vmul.f32 0.125, %v915_v12  ;;  %v933_v22 = vmul.f32 %v897_v9, %v897_v9  ;;  %v931_v24 = vmul.f32 0.125, %v927_v14  ;;  %v935_v25 = vmul.f32 %v899_v13, %v899_v13  ;;  %v3466_v12 = vld [vmem:[#allocation13 + $0x3bc] ss:$28 sps:$4 sm:$0xff]  }
 0x34f   :  { %v936_v23 = vsub.f32 %v928_v15, %v932_v18  ;;  %v938_v26 = vsub.f32 %v930_v19, %v934_v20  ;;  %v4098_v34 = vsub.s32 2, %v4055_v46  ;;  %v4104_v36 = vsub.s32 3, %v4055_v46  ;;  %v3464_v15 = vld [vmem:[#allocation13 + $0x3b8] ss:$28 sps:$4 sm:$0xff]   ;;  %v3467_v18 = vld [vmem:[#allocation13 + $0x3c0] ss:$28 sps:$4 sm:$0xff]  }
 0x350   :  { %v937_v27 = vsub.f32 %v929_v21, %v933_v22  ;;  %v939_v29 = vsub.f32 %v931_v24, %v935_v25  ;;  %v940_v37 = vsub.f32 %v4070_v10, %v896_v5  ;;  %v960_v38 = vrot.slane %v870_v33, %v4058_v47  ;;  %v3472_v19 = vld [vmem:[#allocation13 + $0x3f4] ss:$28 sps:$4 sm:$0xff]   ;;  %v3475_v20 = vld [vmem:[#allocation13 + $0x3fc] ss:$28 sps:$4 sm:$0xff]   ;;  %v3476_v25 = vld [vmem:[#allocation13 + $0x428] ss:$28 sps:$4 sm:$0xff]  }
 0x351   :  { %v944_v28 = vadd.f32 0.8, %v936_v23  ;;  %v946_v30 = vadd.f32 0.8, %v938_v26  ;;  %v942_v40 = vsub.f32 %v4072_v11, %v898_v7  ;;  %v968_v41 = vrot.slane %v870_v33, %v4098_v34  ;;  %v3461_v7 = vld [vmem:[#allocation13 + $0x388] ss:$28 sps:$4 sm:$0xff]  }
 0x352   :  { %v945_v31 = vadd.f32 0.8, %v937_v27  ;;  %v947_v32 = vadd.f32 0.8, %v939_v29  ;;  %v985_v44 = vrot.slane %v871_v35, %v4058_v47  ;;  %v941_v45 = vsub.f32 %v4080_v16, %v897_v9  ;;  %v3470_v21 = vld [vmem:[#allocation13 + $0x3f0] ss:$28 sps:$4 sm:$0xff]  }
 0x353   :  { %3686 = vrsqrt.f32 %v944_v28  ;;  %v964_v48 = vrot.slane %v870_v33, %v4061_v49  ;;  %v993_v52 = vrot.slane %v871_v35, %v4098_v34  ;;  %v943_v10 = vsub.f32 %v4082_v17, %v899_v13  ;;  %v3469_v13 = vld [vmem:[#allocation13 + $0x3c4] ss:$28 sps:$4 sm:$0xff]   ;;  %v3473_v22 = vld [vmem:[#allocation13 + $0x3f8] ss:$28 sps:$4 sm:$0xff]   ;;  %v3478_v23 = vld [vmem:[#allocation13 + $0x42c] ss:$28 sps:$4 sm:$0xff]  }
 0x354   :  { %3688 = vrsqrt.f32 %v946_v30  ;;  %v972_v53 = vrot.slane %v870_v33, %v4104_v36  ;;  %v989_v56 = vrot.slane %v871_v35, %v4061_v49  ;;  %v997_v59 = vrot.slane %v871_v35, %v4104_v36  ;;  %v3481_v24 = vld [vmem:[#allocation13 + $0x434] ss:$28 sps:$4 sm:$0xff]   ;;  %v3484_v27 = vld [vmem:[#allocation13 + $0x464] ss:$28 sps:$4 sm:$0xff]   ;;  %v3487_v28 = vld [vmem:[#allocation13 + $0x46c] ss:$28 sps:$4 sm:$0xff]  }
 0x355   :  { %3690 = vrsqrt.f32 %v945_v31  ;;  %v3479_v26 = vld [vmem:[#allocation13 + $0x430] ss:$28 sps:$4 sm:$0xff]   ;;  %v3482_v29 = vld [vmem:[#allocation13 + $0x460] ss:$28 sps:$4 sm:$0xff]   ;;  %v3485_v30 = vld [vmem:[#allocation13 + $0x468] ss:$28 sps:$4 sm:$0xff]  }
 0x356   :  { %3692 = vrsqrt.f32 %v947_v32  ;;  %v3490_v31 = vld [vmem:[#allocation13 + $0x49c] ss:$28 sps:$4 sm:$0xff]   ;;  %v3493_v32 = vld [vmem:[#allocation13 + $0x4a4] ss:$28 sps:$4 sm:$0xff]  }
 0x357   :  { %v3488_v33 = vld [vmem:[#allocation13 + $0x498] ss:$28 sps:$4 sm:$0xff]   ;;  %v3491_v35 = vld [vmem:[#allocation13 + $0x4a0] ss:$28 sps:$4 sm:$0xff]  }
 0x35d   :  { %v3687_v39 = vpop.eup %3686 }
 0x35e   :  { %v3689_v42 = vpop.eup %3688  ;;  %v952_v43 = vmul.f32 %v3687_v39, %v940_v37  ;;  %v3496_v37 = vld [vmem:[#allocation13 + $0x4d4] ss:$28 sps:$4 sm:$0xff]  }
 0x35f   :  { %v3691_v50 = vpop.eup %3690  ;;  %v954_v51 = vmul.f32 %v3689_v42, %v942_v40  ;;  %v3494_v39 = vld [vmem:[#allocation13 + $0x4d0] ss:$28 sps:$4 sm:$0xff]   ;;  %v3497_v40 = vld [vmem:[#allocation13 + $0x4d8] ss:$28 sps:$4 sm:$0xff]  }
 0x360   :  { %v3693_v54 = vpop.eup %3692  ;;  %v977_v11 = vmul.f32 %v960_v38, %v952_v43  ;;  %v953_v55 = vmul.f32 %v3691_v50, %v941_v45  ;;  %v3499_v38 = vld [vmem:[#allocation13 + $0x4dc] ss:$28 sps:$4 sm:$0xff]   ;;  %v3505_v42 = vld [vmem:[#allocation13 + $0x514] ss:$28 sps:$4 sm:$0xff]   ;;  %v3500_v43 = vld [vmem:[#allocation13 + $0x508] ss:$28 sps:$4 sm:$0xff]  }
 0x361   :  { %v979_v57 = vmul.f32 %v968_v41, %v954_v51  ;;  %v955_v58 = vmul.f32 %v3693_v54, %v943_v10  ;;  %v3502_v41 = vld [vmem:[#allocation13 + $0x50c] ss:$28 sps:$4 sm:$0xff]   ;;  %v3508_v45 = vld [vmem:[#allocation13 + $0x544] ss:$28 sps:$4 sm:$0xff]  }
 0x362   :  { %v1002_v16 = vadd.f32 %v985_v44, %v977_v11  ;;  %v978_v60 = vmul.f32 %v964_v48, %v953_v55  ;;  %v3503_v44 = vld [vmem:[#allocation13 + $0x510] ss:$28 sps:$4 sm:$0xff]   ;;  %v3506_v50 = vld [vmem:[#allocation13 + $0x540] ss:$28 sps:$4 sm:$0xff]   ;;  %v3509_v51 = vld [vmem:[#allocation13 + $0x548] ss:$28 sps:$4 sm:$0xff]  }
 0x363   :  { %v4118_v61 = vadd.f32 %v993_v52, %v979_v57  ;;  %v980_v62 = vmul.f32 %v972_v53, %v955_v58  ;;  %v3511_v48 = vld [vmem:[#allocation13 + $0x54c] ss:$28 sps:$4 sm:$0xff]   ;;  %v3514_v52 = vld [vmem:[#allocation13 + $0x57c] ss:$28 sps:$4 sm:$0xff]   ;;  %v3517_v10 = vld [vmem:[#allocation13 + $0x584] ss:$28 sps:$4 sm:$0xff]  }
 0x364   :  { %v1003_v63 = vadd.f32 %v989_v56, %v978_v60  ;;  %vm1006_vm5 = vcmp.gt.f32.partialorder %v1002_v16, 0.0  ;;  %v1010_v0 = vmul.f32 0.2, %v1002_v16  ;;  %v3512_v53 = vld [vmem:[#allocation13 + $0x578] ss:$28 sps:$4 sm:$0xff]  }
 0x365   :  { %v1005_v17 = vadd.f32 %v997_v59, %v980_v62  ;;  %v3515_v54 = vld [vmem:[#allocation13 + $0x580] ss:$28 sps:$4 sm:$0xff]   ;;  %v3520_v11 = vld [vmem:[#allocation13 + $0x5b4] ss:$28 sps:$4 sm:$0xff]   ;;  %v3526_v58 = vld [vmem:[#allocation13 + $0x5ec] ss:$28 sps:$4 sm:$0xff]  }
 0x366   :  { %vm1007_vm6 = vcmp.gt.f32.partialorder %v1003_v63, 0.0  ;;  %v1011_v1 = vmul.f32 0.2, %v1003_v63  ;;  %v1014_v2 = vsel %vm1006_vm5, %v1002_v16, %v1010_v0  ;;  %v3523_v55 = vld [vmem:[#allocation13 + $0x5bc] ss:$28 sps:$4 sm:$0xff]   ;;  %vm1008_vm8 = vcmp.gt.f32.partialorder %v4118_v61, 0.0 }
 0x367   :  { %vm1009_vm7 = vcmp.gt.f32.partialorder %v1005_v17, 0.0  ;;  %v1013_v3 = vmul.f32 0.2, %v1005_v17  ;;  %v4122_v9 = vpack.c.bf16 %v1014_v2, %v1014_v2  ;;  %v3518_v56 = vld [vmem:[#allocation13 + $0x5b0] ss:$28 sps:$4 sm:$0xff]  }
 0x368   :  { %v1015_v4 = vsel %vm1007_vm6, %v1003_v63, %v1011_v1  ;;  %v3521_v57 = vld [vmem:[#allocation13 + $0x5b8] ss:$28 sps:$4 sm:$0xff]   ;;  %v3524_v16 = vld [vmem:[#allocation13 + $0x5e8] ss:$28 sps:$4 sm:$0xff]   ;;  %v3527_v60 = vld [vmem:[#allocation13 + $0x5f0] ss:$28 sps:$4 sm:$0xff]  }
 0x369   :  { %v4120_v5 = vpack.c.bf16 %v1015_v4, %v1015_v4  ;;  %v1017_v8 = vsel %vm1009_vm7, %v1005_v17, %v1013_v3  ;;  %v3529_v59 = vld [vmem:[#allocation13 + $0x5f4] ss:$28 sps:$4 sm:$0xff]   ;;  %v3532_v62 = vld [vmem:[#allocation13 + $0x624] ss:$28 sps:$4 sm:$0xff]   ;;  %v3535_v63 = vld [vmem:[#allocation13 + $0x62c] ss:$28 sps:$4 sm:$0xff]  }
 0x36a   :  { %v4128_v14 = vpack.c.bf16 %v1017_v8, %v1017_v8  ;;  %v3530_v0 = vld [vmem:[#allocation13 + $0x620] ss:$28 sps:$4 sm:$0xff]   ;;  %v3533_v17 = vld [vmem:[#allocation13 + $0x628] ss:$28 sps:$4 sm:$0xff]   ;;  %v3536_v3 = vld [vmem:[#allocation13 + $0x658] ss:$28 sps:$4 sm:$0xff]  }
 0x36b   :  { %2499 = vmatprep.mubr.bf16.mxu0 %v4120_v5  ;;  %2581 = vmatprep.mubr.bf16.mxu1 %v4120_v5  ;;  %v3538_v1 = vld [vmem:[#allocation13 + $0x65c] ss:$28 sps:$4 sm:$0xff]   ;;  %v3541_v2 = vld [vmem:[#allocation13 + $0x664] ss:$28 sps:$4 sm:$0xff]   ;;  %v3542_v8 = vld [vmem:[#allocation13 + $0x690] ss:$28 sps:$4 sm:$0xff]  }
 0x36c   :  { %2500 = vmatmul.mubr.bf16.vlgmr.msra.gmra.mrb[4].mxu0 %v4122_v9  ;;  %2582 = vmatmul.mubr.bf16.vlgmr.msra.gmra.mrb[8].mxu1 %v4122_v9  ;;  %v3539_v4 = vld [vmem:[#allocation13 + $0x660] ss:$28 sps:$4 sm:$0xff]  }
 0x36d   :  { %2509 = vmatpush1.bf16.msra.mxu0 %v3458_v6  ;;  %2591 = vmatpush1.bf16.msra.mxu1 %v3461_v7  ;;  %v3544_v6 = vld [vmem:[#allocation13 + $0x694] ss:$28 sps:$4 sm:$0xff]   ;;  %v3547_v7 = vld [vmem:[#allocation13 + $0x69c] ss:$28 sps:$4 sm:$0xff]  }
 0x36e   :  { %2540 = vmatprep.mubr.bf16.mxu0 %v4128_v14  ;;  %2622 = vmatprep.mubr.bf16.mxu1 %v4128_v14 }
 0x36f   :  { %2510 = vmatprep.subr.bf16.mxu0 %v3466_v12  ;;  %2592 = vmatprep.subr.bf16.mxu1 %v3469_v13  ;;  %v3545_v12 = vld [vmem:[#allocation13 + $0x698] ss:$28 sps:$4 sm:$0xff]   ;;  %v3550_v13 = vld [vmem:[#allocation13 + $0x6cc] ss:$28 sps:$4 sm:$0xff]  }
 0x371   :  { %2511 = vmatpush1.bf16.msra.mxu0 %v3464_v15  ;;  %2593 = vmatpush1.bf16.msra.mxu1 %v3467_v18  ;;  %v3553_v15 = vld [vmem:[#allocation13 + $0x6d4] ss:$28 sps:$4 sm:$0xff]   ;;  %v1012_v18 = vmul.f32 0.2, %v4118_v61 }
 0x372   :  { %2512 = vmatprep.subr.bf16.mxu0 %v3472_v19  ;;  %2594 = vmatprep.subr.bf16.mxu1 %v3475_v20  ;;  %v3548_v19 = vld [vmem:[#allocation13 + $0x6c8] ss:$28 sps:$4 sm:$0xff]   ;;  %v3551_v20 = vld [vmem:[#allocation13 + $0x6d0] ss:$28 sps:$4 sm:$0xff]  }
 0x375   :  { %2513 = vmatpush1.bf16.msra.mxu0 %v3470_v21  ;;  %2595 = vmatpush1.bf16.msra.mxu1 %v3473_v22  ;;  %v3556_v21 = vld [vmem:[#allocation13 + $0x14] ss:$28 sps:$4 sm:$0xff]  }
 0x376   :  { %2514 = vmatprep.subr.bf16.mxu0 %v3478_v23  ;;  %2596 = vmatprep.subr.bf16.mxu1 %v3481_v24  ;;  %v3557_v22 = vld [vmem:[#allocation13 + $0x1d8] ss:$28 sps:$4 sm:$0xff]   ;;  %v1016_v23 = vsel %vm1008_vm8, %v4118_v61, %v1012_v18  ;;  %v3554_v24 = vld [vmem:[#allocation13 + $0x10] ss:$28 sps:$4 sm:$0xff]  }
 0x377   :  { %v3563_v61 = vld [vmem:[#allocation13 + $0x50] ss:$28 sps:$4 sm:$0xff]  }
 0x378   :  { %v3621_v18 = vld [vmem:[#allocation13 + $0x2ec] ss:$28 sps:$4 sm:$0xff]  }
 0x379   :  { %2515 = vmatpush1.bf16.msra.mxu0 %v3476_v25  ;;  %2597 = vmatpush1.bf16.msra.mxu1 %v3479_v26  ;;  %v4135_v25 = vpack.c.bf16 %v1016_v23, %v1016_v23  ;;  %v3558_v26 = vld [vmem:[#allocation13 + $0x18] ss:$28 sps:$4 sm:$0xff]   ;;  %v3627_v23 = vld [vmem:[#allocation13 + $0x6a8] ss:$28 sps:$4 sm:$0xff]  }
 0x37a   :  { %2516 = vmatprep.subr.bf16.mxu0 %v3484_v27  ;;  %2598 = vmatprep.subr.bf16.mxu1 %v3487_v28  ;;  %v3561_v27 = vld [vmem:[#allocation13 + $0x4c] ss:$28 sps:$4 sm:$0xff]  }
 0x37b   :  { %v3562_v28 = vld [vmem:[#allocation13 + $0x210] ss:$28 sps:$4 sm:$0xff]  }
 0x37d   :  { %2517 = vmatpush1.bf16.msra.mxu0 %v3482_v29  ;;  %2599 = vmatpush1.bf16.msra.mxu1 %v3485_v30  ;;  %v3559_v29 = vld [vmem:[#allocation13 + $0x48] ss:$28 sps:$4 sm:$0xff]  }
 0x37e   :  { %2518 = vmatprep.subr.bf16.mxu0 %v3490_v31  ;;  %2600 = vmatprep.subr.bf16.mxu1 %v3493_v32  ;;  %v3566_v30 = vld [vmem:[#allocation13 + $0x84] ss:$28 sps:$4 sm:$0xff]  }
 0x37f   :  { %v3567_v31 = vld [vmem:[#allocation13 + $0x248] ss:$28 sps:$4 sm:$0xff]   ;;  %v3564_v32 = vld [vmem:[#allocation13 + $0x80] ss:$28 sps:$4 sm:$0xff]  }
 0x381   :  { %2519 = vmatpush1.bf16.msra.mxu0 %v3488_v33  ;;  %2601 = vmatpush1.bf16.msra.mxu1 %v3491_v35  ;;  %v3568_v33 = vld [vmem:[#allocation13 + $0x88] ss:$28 sps:$4 sm:$0xff]   ;;  %v3571_v35 = vld [vmem:[#allocation13 + $0xbc] ss:$28 sps:$4 sm:$0xff]  }
 0x382   :  { %2520 = vmatprep.subr.bf16.mxu0 %v3496_v37  ;;  %2602 = vmatprep.subr.bf16.mxu1 %v3499_v38  ;;  %v3572_v37 = vld [vmem:[#allocation13 + $0x280] ss:$28 sps:$4 sm:$0xff]   ;;  %v3569_v38 = vld [vmem:[#allocation13 + $0xb8] ss:$28 sps:$4 sm:$0xff]  }
 0x385   :  { %2521 = vmatpush1.bf16.msra.mxu0 %v3494_v39  ;;  %2603 = vmatpush1.bf16.msra.mxu1 %v3497_v40  ;;  %v3573_v39 = vld [vmem:[#allocation13 + $0xc0] ss:$28 sps:$4 sm:$0xff]   ;;  %v3576_v40 = vld [vmem:[#allocation13 + $0xf4] ss:$28 sps:$4 sm:$0xff]  }
 0x386   :  { %2522 = vmatprep.subr.bf16.mxu0 %v3502_v41  ;;  %2604 = vmatprep.subr.bf16.mxu1 %v3505_v42  ;;  %v3574_v41 = vld [vmem:[#allocation13 + $0xf0] ss:$28 sps:$4 sm:$0xff]   ;;  %v3578_v42 = vld [vmem:[#allocation13 + $0xf8] ss:$28 sps:$4 sm:$0xff]  }
 0x389   :  { %2523 = vmatpush1.bf16.msra.mxu0 %v3500_v43  ;;  %2605 = vmatpush1.bf16.msra.mxu1 %v3503_v44  ;;  %v3581_v43 = vld [vmem:[#allocation13 + $0x12c] ss:$28 sps:$4 sm:$0xff]  }
 0x38a   :  { %2524 = vmatprep.subr.bf16.mxu0 %v3508_v45  ;;  %2606 = vmatprep.subr.bf16.mxu1 %v3511_v48  ;;  %v3582_v44 = vld [vmem:[#allocation13 + $0x2f0] ss:$28 sps:$4 sm:$0xff]   ;;  %v3579_v45 = vld [vmem:[#allocation13 + $0x128] ss:$28 sps:$4 sm:$0xff]  }
 0x38b   :  { %v3583_v48 = vld [vmem:[#allocation13 + $0x130] ss:$28 sps:$4 sm:$0xff]  }
 0x38d   :  { %2525 = vmatpush1.bf16.msra.mxu0 %v3506_v50  ;;  %2607 = vmatpush1.bf16.msra.mxu1 %v3509_v51  ;;  %v3586_v50 = vld [vmem:[#allocation13 + $0x164] ss:$28 sps:$4 sm:$0xff]  }
 0x38e   :  { %2526 = vmatprep.subr.bf16.mxu0 %v3514_v52  ;;  %2608 = vmatprep.subr.bf16.mxu1 %v3517_v10  ;;  %v3587_v51 = vld [vmem:[#allocation13 + $0x328] ss:$28 sps:$4 sm:$0xff]   ;;  %v3584_v52 = vld [vmem:[#allocation13 + $0x160] ss:$28 sps:$4 sm:$0xff]  }
 0x38f   :  { %v3588_v10 = vld [vmem:[#allocation13 + $0x168] ss:$28 sps:$4 sm:$0xff]  }
 0x391   :  { %2527 = vmatpush1.bf16.msra.mxu0 %v3512_v53  ;;  %2609 = vmatpush1.bf16.msra.mxu1 %v3515_v54  ;;  %v3591_v53 = vld [vmem:[#allocation13 + $0x19c] ss:$28 sps:$4 sm:$0xff]  }
 0x392   :  { %2528 = vmatprep.subr.bf16.mxu0 %v3520_v11  ;;  %2610 = vmatprep.subr.bf16.mxu1 %v3523_v55  ;;  %v3592_v54 = vld [vmem:[#allocation13 + $0x360] ss:$28 sps:$4 sm:$0xff]   ;;  %v3589_v11 = vld [vmem:[#allocation13 + $0x198] ss:$28 sps:$4 sm:$0xff]  }
 0x393   :  { %v3593_v55 = vld [vmem:[#allocation13 + $0x1a0] ss:$28 sps:$4 sm:$0xff]  }
 0x395   :  { %2529 = vmatpush1.bf16.msra.mxu0 %v3518_v56  ;;  %2611 = vmatpush1.bf16.msra.mxu1 %v3521_v57  ;;  %v3596_v56 = vld [vmem:[#allocation13 + $0x1d4] ss:$28 sps:$4 sm:$0xff]  }
 0x396   :  { %2530 = vmatprep.subr.bf16.mxu0 %v3526_v58  ;;  %2612 = vmatprep.subr.bf16.mxu1 %v3529_v59  ;;  %v3597_v57 = vld [vmem:[#allocation13 + $0x558] ss:$28 sps:$4 sm:$0xff]   ;;  %v3594_v58 = vld [vmem:[#allocation13 + $0x1d0] ss:$28 sps:$4 sm:$0xff]  }
 0x397   :  { %v3598_v59 = vld [vmem:[#allocation13 + $0x398] ss:$28 sps:$4 sm:$0xff]  }
 0x399   :  { %2531 = vmatpush1.bf16.msra.mxu0 %v3524_v16  ;;  %2613 = vmatpush1.bf16.msra.mxu1 %v3527_v60  ;;  %v3601_v16 = vld [vmem:[#allocation13 + $0x20c] ss:$28 sps:$4 sm:$0xff]  }
 0x39a   :  { %2532 = vmatprep.subr.bf16.mxu0 %v3532_v62  ;;  %2614 = vmatprep.subr.bf16.mxu1 %v3535_v63  ;;  %v3602_v60 = vld [vmem:[#allocation13 + $0x590] ss:$28 sps:$4 sm:$0xff]   ;;  %v3599_v62 = vld [vmem:[#allocation13 + $0x208] ss:$28 sps:$4 sm:$0xff]  }
 0x39b   :  { %v3603_v63 = vld [vmem:[#allocation13 + $0x3d0] ss:$28 sps:$4 sm:$0xff]  }
 0x39d   :  { %2533 = vmatpush1.bf16.msra.mxu0 %v3530_v0  ;;  %2615 = vmatpush1.bf16.msra.mxu1 %v3533_v17  ;;  %v3606_v0 = vld [vmem:[#allocation13 + $0x244] ss:$28 sps:$4 sm:$0xff]  }
 0x39e   :  { %2534 = vmatprep.subr.bf16.mxu0 %v3538_v1  ;;  %2616 = vmatprep.subr.bf16.mxu1 %v3541_v2  ;;  %v3607_v17 = vld [vmem:[#allocation13 + $0x5c8] ss:$28 sps:$4 sm:$0xff]   ;;  %v3604_v1 = vld [vmem:[#allocation13 + $0x240] ss:$28 sps:$4 sm:$0xff]  }
 0x39f   :  { %v3608_v2 = vld [vmem:[#allocation13 + $0x408] ss:$28 sps:$4 sm:$0xff]  }
 0x3a1   :  { %2535 = vmatpush1.bf16.msra.mxu0 %v3536_v3  ;;  %2617 = vmatpush1.bf16.msra.mxu1 %v3539_v4  ;;  %v3611_v3 = vld [vmem:[#allocation13 + $0x27c] ss:$28 sps:$4 sm:$0xff]  }
 0x3a2   :  { %2536 = vmatprep.subr.bf16.mxu0 %v3544_v6  ;;  %2618 = vmatprep.subr.bf16.mxu1 %v3547_v7  ;;  %v3612_v4 = vld [vmem:[#allocation13 + $0x600] ss:$28 sps:$4 sm:$0xff]   ;;  %v3609_v6 = vld [vmem:[#allocation13 + $0x278] ss:$28 sps:$4 sm:$0xff]  }
 0x3a3   :  { %v3613_v7 = vld [vmem:[#allocation13 + $0x440] ss:$28 sps:$4 sm:$0xff]  }
 0x3a5   :  { %2537 = vmatpush1.bf16.msra.mxu0 %v3542_v8  ;;  %2619 = vmatpush1.bf16.msra.mxu1 %v3545_v12  ;;  %v3616_v8 = vld [vmem:[#allocation13 + $0x2b4] ss:$28 sps:$4 sm:$0xff]  }
 0x3a6   :  { %2538 = vmatprep.subr.bf16.mxu0 %v3550_v13  ;;  %2620 = vmatprep.subr.bf16.mxu1 %v3553_v15  ;;  %v3617_v12 = vld [vmem:[#allocation13 + $0x638] ss:$28 sps:$4 sm:$0xff]   ;;  %v3614_v13 = vld [vmem:[#allocation13 + $0x2b0] ss:$28 sps:$4 sm:$0xff]  }
 0x3a7   :  { %v3618_v15 = vld [vmem:[#allocation13 + $0x478] ss:$28 sps:$4 sm:$0xff]  }
 0x3a9   :  { %2539 = vmatpush1.bf16.msra.mxu0 %v3548_v19  ;;  %2621 = vmatpush1.bf16.msra.mxu1 %v3551_v20  ;;  %v3622_v19 = vld [vmem:[#allocation13 + $0x670] ss:$28 sps:$4 sm:$0xff]   ;;  %v3619_v20 = vld [vmem:[#allocation13 + $0x2e8] ss:$28 sps:$4 sm:$0xff]  }
 0x3aa   :  { %2631 = vmatprep.subr.bf16.mxu0 %v3556_v21  ;;  %3124 = vmatprep.subr.bf16.mxu1 %v3557_v22  ;;  %v3623_v21 = vld [vmem:[#allocation13 + $0x4b0] ss:$28 sps:$4 sm:$0xff]   ;;  %v3626_v22 = vld [vmem:[#allocation13 + $0x324] ss:$28 sps:$4 sm:$0xff]  }
 0x3ac   :  { %2541 = vmatmul.mubr.bf16.vlgmr.msra.gmra.mrb[4].mxu0 %v4135_v25  ;;  %2623 = vmatmul.mubr.bf16.vlgmr.msra.gmra.mrb[8].mxu1 %v4135_v25 }
 0x3ad   :  { %2632 = vmatpush1.bf16.msra.mxu0 %v3554_v24  ;;  %2663 = vmatprep.mubr.bf16.mxu0 %v4120_v5  ;;  %v3624_v24 = vld [vmem:[#allocation13 + $0x320] ss:$28 sps:$4 sm:$0xff]  }
 0x3ae   :  { %3125 = vmatpush3.bf16.msra.mxu1 %v3558_v26  ;;  %2745 = vmatprep.mubr.bf16.mxu1 %v4120_v5  ;;  %v3577_v5 = vld [vmem:[#allocation13 + $0x2b8] ss:$28 sps:$4 sm:$0xff]   ;;  %v3628_v26 = vld [vmem:[#allocation13 + $0x4e8] ss:$28 sps:$4 sm:$0xff]  }
 0x3af   :  { %2633 = vmatprep.subr.bf16.mxu0 %v3561_v27  ;;  %3126 = vmatprep.subr.bf16.mxu1 %v3562_v28  ;;  %v3631_v27 = vld [vmem:[#allocation13 + $0x35c] ss:$28 sps:$4 sm:$0xff]  }
 0x3b0   :  { %v3632_v28 = vld [vmem:[#allocation13 + $0x6e0] ss:$28 sps:$4 sm:$0xff]  }
 0x3b1   :  { %2634 = vmatpush1.bf16.msra.mxu0 %v3559_v29  ;;  %v3629_v29 = vld [vmem:[#allocation13 + $0x358] ss:$28 sps:$4 sm:$0xff]  }
 0x3b2   :  { %3127 = vmatpush3.bf16.msra.mxu1 %v3563_v61  ;;  %2635 = vmatprep.subr.bf16.mxu0 %v3566_v30  ;;  %v3633_v61 = vld [vmem:[#allocation13 + $0x520] ss:$28 sps:$4 sm:$0xff]   ;;  %v3636_v30 = vld [vmem:[#allocation13 + $0x394] ss:$28 sps:$4 sm:$0xff]  }
 0x3b3   :  { %3128 = vmatprep.subr.bf16.mxu1 %v3567_v31  ;;  %v3634_v31 = vld [vmem:[#allocation13 + $0x390] ss:$28 sps:$4 sm:$0xff]  }
 0x3b5   :  { %2636 = vmatpush1.bf16.msra.mxu0 %v3564_v32  ;;  %v3639_v32 = vld [vmem:[#allocation13 + $0x3cc] ss:$28 sps:$4 sm:$0xff]  }
 0x3b6   :  { %3129 = vmatpush3.bf16.msra.mxu1 %v3568_v33  ;;  %2637 = vmatprep.subr.bf16.mxu0 %v3571_v35  ;;  %v3637_v33 = vld [vmem:[#allocation13 + $0x3c8] ss:$28 sps:$4 sm:$0xff]  }
 0x3b7   :  { %3130 = vmatprep.subr.bf16.mxu1 %v3572_v37  ;;  %v3642_v35 = vld [vmem:[#allocation13 + $0x404] ss:$28 sps:$4 sm:$0xff]  }
 0x3b8   :  { %v3640_v37 = vld [vmem:[#allocation13 + $0x400] ss:$28 sps:$4 sm:$0xff]  }
 0x3b9   :  { %2638 = vmatpush1.bf16.msra.mxu0 %v3569_v38  ;;  %v3645_v38 = vld [vmem:[#allocation13 + $0x43c] ss:$28 sps:$4 sm:$0xff]  }
 0x3ba   :  { %3131 = vmatpush3.bf16.msra.mxu1 %v3573_v39  ;;  %2639 = vmatprep.subr.bf16.mxu0 %v3576_v40  ;;  %v3643_v39 = vld [vmem:[#allocation13 + $0x438] ss:$28 sps:$4 sm:$0xff]  }
 0x3bb   :  { %3132 = vmatprep.subr.bf16.mxu1 %v3577_v5  ;;  %v3648_v40 = vld [vmem:[#allocation13 + $0x474] ss:$28 sps:$4 sm:$0xff]  }
 0x3bc   :  { %v3646_v5 = vld [vmem:[#allocation13 + $0x470] ss:$28 sps:$4 sm:$0xff]  }
 0x3bd   :  { %2640 = vmatpush1.bf16.msra.mxu0 %v3574_v41  ;;  %v3649_v41 = vld [vmem:[#allocation13 + $0x4a8] ss:$28 sps:$4 sm:$0xff]  }
 0x3be   :  { %3133 = vmatpush3.bf16.msra.mxu1 %v3578_v42  ;;  %2641 = vmatprep.subr.bf16.mxu0 %v3581_v43  ;;  %v3654_v42 = vld [vmem:[#allocation13 + $0x4e4] ss:$28 sps:$4 sm:$0xff]   ;;  %v3657_v43 = vld [vmem:[#allocation13 + $0x51c] ss:$28 sps:$4 sm:$0xff]  }
 0x3bf   :  { %3134 = vmatprep.subr.bf16.mxu1 %v3582_v44  ;;  %v3655_v44 = vld [vmem:[#allocation13 + $0x518] ss:$28 sps:$4 sm:$0xff]  }
 0x3c1   :  { %2642 = vmatpush1.bf16.msra.mxu0 %v3579_v45  ;;  %v3660_v45 = vld [vmem:[#allocation13 + $0x554] ss:$28 sps:$4 sm:$0xff]  }
 0x3c2   :  { %3135 = vmatpush3.bf16.msra.mxu1 %v3583_v48  ;;  %2643 = vmatprep.subr.bf16.mxu0 %v3586_v50  ;;  %v3658_v48 = vld [vmem:[#allocation13 + $0x550] ss:$28 sps:$4 sm:$0xff]  }
 0x3c3   :  { %3136 = vmatprep.subr.bf16.mxu1 %v3587_v51  ;;  %v3663_v50 = vld [vmem:[#allocation13 + $0x58c] ss:$28 sps:$4 sm:$0xff]  }
 0x3c4   :  { %v3661_v51 = vld [vmem:[#allocation13 + $0x588] ss:$28 sps:$4 sm:$0xff]  }
 0x3c5   :  { %2644 = vmatpush1.bf16.msra.mxu0 %v3584_v52  ;;  %v3666_v52 = vld [vmem:[#allocation13 + $0x5c4] ss:$28 sps:$4 sm:$0xff]  }
 0x3c6   :  { %3137 = vmatpush3.bf16.msra.mxu1 %v3588_v10  ;;  %2645 = vmatprep.subr.bf16.mxu0 %v3591_v53  ;;  %v3664_v10 = vld [vmem:[#allocation13 + $0x5c0] ss:$28 sps:$4 sm:$0xff]  }
 0x3c7   :  { %3138 = vmatprep.subr.bf16.mxu1 %v3592_v54  ;;  %v3669_v53 = vld [vmem:[#allocation13 + $0x5fc] ss:$28 sps:$4 sm:$0xff]  }
 0x3c8   :  { %v3667_v54 = vld [vmem:[#allocation13 + $0x5f8] ss:$28 sps:$4 sm:$0xff]  }
 0x3c9   :  { %2646 = vmatpush1.bf16.msra.mxu0 %v3589_v11  ;;  %v3672_v11 = vld [vmem:[#allocation13 + $0x634] ss:$28 sps:$4 sm:$0xff]  }
 0x3ca   :  { %3139 = vmatpush3.bf16.msra.mxu1 %v3593_v55  ;;  %2647 = vmatprep.subr.bf16.mxu0 %v3596_v56  ;;  %v3670_v55 = vld [vmem:[#allocation13 + $0x630] ss:$28 sps:$4 sm:$0xff]  }
 0x3cb   :  { %3146 = vmatprep.subr.bf16.mxu1 %v3597_v57  ;;  %v3675_v56 = vld [vmem:[#allocation13 + $0x66c] ss:$28 sps:$4 sm:$0xff]  }
 0x3cc   :  { %v3673_v57 = vld [vmem:[#allocation13 + $0x668] ss:$28 sps:$4 sm:$0xff]  }
 0x3cd   :  { %2746 = vmatmul.mubr.bf16.vlgmr.msra.gmra.mrb[12].mxu1 %v4122_v9  ;;  %2648 = vmatpush1.bf16.msra.mxu0 %v3594_v58  ;;  %v3678_v58 = vld [vmem:[#allocation13 + $0x6a4] ss:$28 sps:$4 sm:$0xff]  }
 0x3ce   :  { %3147 = vmatpush3.bf16.msra.mxu1 %v3598_v59  ;;  %2785 = vmatprep.mubr.bf16.mxu1 %v4128_v14  ;;  %v3676_v59 = vld [vmem:[#allocation13 + $0x6a0] ss:$28 sps:$4 sm:$0xff]  }
 0x3cf   :  { %2649 = vmatprep.subr.bf16.mxu0 %v3601_v16  ;;  %3148 = vmatprep.subr.bf16.mxu1 %v3602_v60  ;;  %v3681_v16 = vld [vmem:[#allocation13 + $0x6dc] ss:$28 sps:$4 sm:$0xff]  }
 0x3d0   :  { %v3679_v60 = vld [vmem:[#allocation13 + $0x6d8] ss:$28 sps:$4 sm:$0xff]  }
 0x3d1   :  { %2650 = vmatpush1.bf16.msra.mxu0 %v3599_v62  ;;  %v1278_v62 = vld [vmem:[%s4179_s10] sm:$0xff]  ;;  %s3910_s10 = smov [#allocation14]  }
 0x3d2   :  { %3149 = vmatpush3.bf16.msra.mxu1 %v3603_v63  ;;  %2651 = vmatprep.subr.bf16.mxu0 %v3606_v0  ;;  %v1283_v63 = vrot.slane %v1278_v62, %v4058_v47  ;;  %v1291_v0 = vrot.slane %v1278_v62, %v4098_v34  ;;  %s2813_s25 = sshll.u32 %s3910_s10, 4  ;;  %s2814_s25 = int_to_ptr.vmem [resolvable:$true] %s2813_s25 }
 0x3d3   :  { %3150 = vmatprep.subr.bf16.mxu1 %v3607_v17  ;;  %v1287_v17 = vrot.slane %v1278_v62, %v4061_v49  ;;  %s3862_s27 = scalar_lea.vmem %s2814_s25, 896  ;;  %p3867_p1 = scmp.lt.s32.totalorder %s2814_s25, %s2814_s25 }
 0x3d4   :  { %p3863_p0 = scmp.ne.s32.totalorder %s2814_s25, %s3862_s27  ;;  %p3868_p2 = scmp.lt.s32.totalorder %s3862_s27, %s3862_s27 }
 0x3d5   :  { %2652 = vmatpush1.bf16.msra.mxu0 %v3604_v1  ;;  %v1295_v1 = vrot.slane %v1278_v62, %v4104_v36 }
 0x3d6   :  { %3151 = vmatpush3.bf16.msra.mxu1 %v3608_v2  ;;  %2653 = vmatprep.subr.bf16.mxu0 %v3611_v3  ;;  %p3869_p3 = por %p3868_p2, %p3867_p1 }
 0x3d7   :  { %3152 = vmatprep.subr.bf16.mxu1 %v3612_v4 }
 0x3d8   :  { %p3870_p4 = pnand %p3869_p3, %p3863_p0 }
 0x3d9   :  { %2654 = vmatpush1.bf16.msra.mxu0 %v3609_v6 }
 0x3da   :  { %3153 = vmatpush3.bf16.msra.mxu1 %v3613_v7  ;;  %2655 = vmatprep.subr.bf16.mxu0 %v3616_v8 }
 0x3db   :  { %3154 = vmatprep.subr.bf16.mxu1 %v3617_v12 }
 0x3dd   :  { %2656 = vmatpush1.bf16.msra.mxu0 %v3614_v13 }
 0x3de   :  { %3155 = vmatpush3.bf16.msra.mxu1 %v3618_v15  ;;  %2657 = vmatprep.subr.bf16.mxu0 %v3621_v18 }
 0x3df   :  { %3156 = vmatprep.subr.bf16.mxu1 %v3622_v19 }
 0x3e1   :  { %2658 = vmatpush1.bf16.msra.mxu0 %v3619_v20 }
 0x3e2   :  { %3157 = vmatpush3.bf16.msra.mxu1 %v3623_v21  ;;  %2659 = vmatprep.subr.bf16.mxu0 %v3626_v22 }
 0x3e3   :  { %3158 = vmatprep.subr.bf16.mxu1 %v3627_v23 }
 0x3e5   :  { %2660 = vmatpush1.bf16.msra.mxu0 %v3624_v24 }
 0x3e6   :  { %3159 = vmatpush3.bf16.msra.mxu1 %v3628_v26  ;;  %2661 = vmatprep.subr.bf16.mxu0 %v3631_v27  ;;  %v1306_v26 = vsub.s32 6, %v4055_v46 }
 0x3e7   :  { %3160 = vmatprep.subr.bf16.mxu1 %v3632_v28 }
 0x3e8   :  { %v1307_v27 = vrot.slane %v1278_v62, %v1306_v26 }
 0x3e9   :  { %2662 = vmatpush1.bf16.msra.mxu0 %v3629_v29 }
 0x3ea   :  { %3161 = vmatpush3.bf16.msra.mxu1 %v3633_v61  ;;  %2672 = vmatprep.subr.bf16.mxu0 %v3636_v30 }
 0x3ec   :  { %2664 = vmatmul.mubr.bf16.vlgmr.msra.gmra.mrb[8].mxu0 %v4122_v9  ;;  %v3651_v9 = vld [vmem:[#allocation13 + $0x4ac] ss:$28 sps:$4 sm:$0xff]  }
 0x3ed   :  { %2786 = vmatmul.mubr.bf16.vlgmr.msra.gmra.mrb[16].mxu1 %v4135_v25  ;;  %2673 = vmatpush1.bf16.msra.mxu0 %v3634_v31 }
 0x3ee   :  { %2704 = vmatprep.mubr.bf16.mxu0 %v4128_v14  ;;  %2674 = vmatprep.subr.bf16.mxu0 %v3639_v32  ;;  %v3652_v14 = vld [vmem:[#allocation13 + $0x4e0] ss:$28 sps:$4 sm:$0xff]  }
 0x3f1   :  { %2675 = vmatpush1.bf16.msra.mxu0 %v3637_v33 }
 0x3f2   :  { %2676 = vmatprep.subr.bf16.mxu0 %v3642_v35 }
 0x3f5   :  { %2677 = vmatpush1.bf16.msra.mxu0 %v3640_v37  ;;  %v1298_v37 = vsub.s32 4, %v4055_v46 }
 0x3f6   :  { %2678 = vmatprep.subr.bf16.mxu0 %v3645_v38  ;;  %v1302_v38 = vsub.s32 5, %v4055_v46 }
 0x3f9   :  { %2679 = vmatpush1.bf16.msra.mxu0 %v3643_v39  ;;  %v1299_v39 = vrot.slane %v1278_v62, %v1298_v37 }
 0x3fa   :  { %2680 = vmatprep.subr.bf16.mxu0 %v3648_v40  ;;  %v1303_v40 = vrot.slane %v1278_v62, %v1302_v38 }
 0x3fd   :  { %2681 = vmatpush1.bf16.msra.mxu0 %v3646_v5 }
 0x3fe   :  { %2682 = vmatprep.subr.bf16.mxu0 %v3651_v9 }
 0x401   :  { %2683 = vmatpush1.bf16.msra.mxu0 %v3649_v41 }
 0x402   :  { %2684 = vmatprep.subr.bf16.mxu0 %v3654_v42 }
 0x405   :  { %2685 = vmatpush1.bf16.msra.mxu0 %v3652_v14 }
 0x406   :  { %2686 = vmatprep.subr.bf16.mxu0 %v3657_v43 }
 0x409   :  { %2687 = vmatpush1.bf16.msra.mxu0 %v3655_v44 }
 0x40a   :  { %2688 = vmatprep.subr.bf16.mxu0 %v3660_v45 }
 0x40d   :  { %2689 = vmatpush1.bf16.msra.mxu0 %v3658_v48 }
 0x40e   :  { %2690 = vmatprep.subr.bf16.mxu0 %v3663_v50 }
 0x411   :  { %2691 = vmatpush1.bf16.msra.mxu0 %v3661_v51 }
 0x412   :  { %2692 = vmatprep.subr.bf16.mxu0 %v3666_v52 }
 0x415   :  { %2693 = vmatpush1.bf16.msra.mxu0 %v3664_v10 }
 0x416   :  { %2694 = vmatprep.subr.bf16.mxu0 %v3669_v53 }
 0x419   :  { %2695 = vmatpush1.bf16.msra.mxu0 %v3667_v54 }
 0x41a   :  { %2696 = vmatprep.subr.bf16.mxu0 %v3672_v11 }
 0x41d   :  { %2697 = vmatpush1.bf16.msra.mxu0 %v3670_v55 }
 0x41e   :  { %2698 = vmatprep.subr.bf16.mxu0 %v3675_v56 }
 0x421   :  { %2699 = vmatpush1.bf16.msra.mxu0 %v3673_v57 }
 0x422   :  { %2700 = vmatprep.subr.bf16.mxu0 %v3678_v58 }
 0x425   :  { %2701 = vmatpush1.bf16.msra.mxu0 %v3676_v59 }
 0x426   :  { %2702 = vmatprep.subr.bf16.mxu0 %v3681_v16 }
 0x429   :  { %2703 = vmatpush1.bf16.msra.mxu0 %v3679_v60 }
 0x42c   :  { %2705 = vmatmul.mubr.bf16.vlgmr.msra.gmra.mrb[8].mxu0 %v4135_v25 }
 0x47f   :  { %v2542_v2 = vpop.f32.mrb[4].mxu0  ;;  %v2624_v3 = vpop.f32.mrb[8].mxu1 }
 0x480   :  { %v3231_v4 = vadd.f32 %v2542_v2, %v1283_v63  ;;  %v3233_v6 = vadd.f32 %v2624_v3, %v1291_v0  ;;  %v2544_v7 = vpop.f32.mrb[5].mxu0  ;;  %v2626_v8 = vpop.f32.mrb[9].mxu1 }
 0x481   :  { %v3232_v12 = vadd.f32 %v2544_v7, %v1287_v17  ;;  %v3234_v25 = vadd.f32 %v2626_v8, %v1295_v1  ;;  %v2546_v13 = vpop.f32.mrb[6].mxu0  ;;  %v2628_v15 = vpop.f32.mrb[10].mxu1 }
 0x482   :  { %3694 = vtanh.f32 %v3231_v4  ;;  %v2547_v18 = vpop.f32.mrb[7].mxu0  ;;  %v2629_v19 = vpop.f32.mrb[11].mxu1 }
 0x483   :  { %3696 = vtanh.f32 %v3233_v6 }
 0x484   :  { %3698 = vtanh.f32 %v3232_v12 }
 0x485   :  { %3700 = vtanh.f32 %v3234_v25 }
 0x48c   :  { %v3695_v47 = vpop.eup %3694 }
 0x48d   :  { %v3697_v49 = vpop.eup %3696  ;;  %2800 = vst [vmem:[#allocation14] sm:$0xff] %v3695_v47 }
 0x48e   :  { %v3699_v34 = vpop.eup %3698  ;;  %2802 = vst [vmem:[#allocation14 + $0x10] sm:$0xff] %v3697_v49 }
 0x48f   :  { %v3701_v36 = vpop.eup %3700  ;;  %2801 = vst [vmem:[#allocation14 + $0x8] sm:$0xff] %v3699_v34 }
 0x490   :  { %2803 = vst [vmem:[#allocation14 + $0x18] sm:$0xff] %v3701_v36 }
 0x4a0   :  { %v3140_v20 = vpop.f32.mrb[12].mxu1 }
 0x4a1   :  { %v3141_v21 = vpop.f32.mrb[13].mxu1 }
 0x4a2   :  { %v3142_v22 = vadd.f32 %v3141_v21, %v3140_v20  ;;  %v3143_v23 = vpop.f32.mrb[14].mxu1 }
 0x4a3   :  { %v3144_v24 = vpop.f32.mrb[15].mxu1 }
 0x4a4   :  { %v2748_v61 = vadd.f32 %v3142_v22, %v1307_v27 }
 0x4c0   :  { %v3162_v28 = vpop.f32.mrb[16].mxu1 }
 0x4c1   :  { %v3163_v29 = vpop.f32.mrb[17].mxu1 }
 0x4c2   :  { %v3164_v30 = vadd.f32 %v3163_v29, %v3162_v28  ;;  %v3165_v31 = vpop.f32.mrb[18].mxu1 }
 0x4c3   :  { %v3166_v32 = vpop.f32.mrb[19].mxu1 }
 0x4c4   :  { %v2788_v33 = vadd.f32 %v3164_v30, %v2748_v61 }
 0x4c6   :  { %3702 = vtanh.f32 %v2788_v33 }
 0x4d0   :  { %v3703_v35 = vpop.eup %3702 }
 0x4d1   :  { %2806 = vst [vmem:[#allocation14 + $0x30] sm:$0xff] %v3703_v35 }
 0x4ff   :  { %v2706_v5 = vpop.f32.mrb[8].mxu0 }
 0x500   :  { %v3235_v9 = vadd.f32 %v2706_v5, %v1299_v39  ;;  %v2708_v41 = vpop.f32.mrb[9].mxu0 }
 0x501   :  { %v3236_v42 = vadd.f32 %v2708_v41, %v1303_v40  ;;  %v2710_v14 = vpop.f32.mrb[10].mxu0 }
 0x502   :  { %3704 = vtanh.f32 %v3235_v9  ;;  %v2711_v43 = vpop.f32.mrb[11].mxu0 }
 0x503   :  { %3706 = vtanh.f32 %v3236_v42 }
 0x50c   :  { %v3705_v44 = vpop.eup %3704 }
 0x50d   :  { %v3707_v45 = vpop.eup %3706  ;;  %2804 = vst [vmem:[#allocation14 + $0x20] sm:$0xff] %v3705_v44 }
 0x50e   :  { %2805 = vst [vmem:[#allocation14 + $0x28] sm:$0xff] %v3707_v45 }
 0x50f   :  { %3873 = shalt.err (!%p3870_p4)
}
 0x510   :  { %s3874_s1 = scalar_lea.hbm %s4180_s11, 896 }
 0x511   :  { %p3875_p5 = scmp.ne.s32.totalorder %s4180_s11, %s3874_s1  ;;  %p3878_p6 = scmp.lt.u32.totalorder %s3874_s1, %s4180_s11 }
 0x513   :  { %p3880_p7 = pnand %p3878_p6, %p3875_p5 }
 0x515   :  { %3883 = shalt.err (!%p3880_p7)
}
 0x516   :  { %2816 = dma.vmem_to_hbm [thread:$0]  %s2814_s25, 896, %s4180_s11, [#allocation4]  }
 0x517   :  { %3892 = dma.done.wait [#allocation4], 896  }
 0x518   :  { %3893 = vsyncadd [#allocation4], 4294966400 }
 0x519   :  { %2820 = vsyncpa [#allocation3], 1 }
 0x51a   :  { %2821 = vsyncpa [#allocation6], 1 }
 0x51b   :  { %2822 = vsyncpa [#allocation9], 1 }
 0x51c   :  { %2823 = vsyncpa [#allocation12], 1 }
 0x51d   :  { %2824 = vsyncpa [#allocation4], 1 }

</bundles_post_ra>
